<compile_context>
chip_gen: v6e
topology: v6e:2x2x1
jax: 0.10.0
libtpu: 0.0.40
codegen_flags: <defaults>
</compile_context>

<pallas_src>
import functools

import jax
import jax.numpy as jnp
from jax.experimental import pallas as pl
from jax.experimental.pallas import tpu as pltpu

# TODO(synk): `diameter` is an undefined global in the reference PyTorch source;
# it is treated here as a fixed scalar constant.
DIAMETER = 16.0
BN_EPS = 1e-5
NORM_EPS = 1e-12
INV_TEMP = 100.0          # logits /= 0.01
DROP_P = 0.2
KEEP_PROB = 1.0 - DROP_P


# ------------------------------ BlockSpecs -----------------------------------
def _shared_spec(shape):
    nd = len(shape)
    return pl.BlockSpec(tuple(shape), lambda g, nd=nd: (0,) * nd)


def _stacked_spec(per_shape):
    # array shape is (2, *per_shape); leading axis selected by program_id, squeezed.
    nd = len(per_shape)
    return pl.BlockSpec((None,) + tuple(per_shape),
                        lambda g, nd=nd: (g,) + (0,) * nd)


# ------------------------ Fused MoCo forward kernel ---------------------------
def _fused_moco_kernel(
        a_ref, x_ref, edges_ref, queue_ref, qw_ref,          # shared inputs
        w1_ref, b1_ref, w2_ref, b2_ref,
        bn_g_ref, bn_b_ref, be_g_ref, be_b_ref, bd_g_ref, bd_b_ref,
        w0_ref, b0_ref, wcat_ref, bcat_ref, demb_ref, drop_ref,  # per-encoder (stacked)
        embs_ref, lpos_ref, lneg_ref,                         # outputs
        q_sc,                                                 # VMEM scratch (B, C)
        *, c_out, batch, row_off):
    g = pl.program_id(0)                                      # 0 = q encoder, 1 = k encoder

    # ---- conv1: relu(A @ (X @ W1) + b1) --------------------------------------
    xw = jnp.dot(x_ref[...], w1_ref[...], preferred_element_type=jnp.float32)
    h1 = jnp.dot(a_ref[...], xw, preferred_element_type=jnp.float32) + b1_ref[...]
    h1 = jnp.maximum(h1, 0.0)

    # ---- dropout(p=0.2): pre-scaled keep mask (generated in glue) ------------
    h1 = h1 * drop_ref[...]

    # ---- conv2: A @ (h1 @ W2) + b2 -------------------------------------------
    hw = jnp.dot(h1, w2_ref[...], preferred_element_type=jnp.float32)
    h2 = jnp.dot(a_ref[...], hw, preferred_element_type=jnp.float32) + b2_ref[...]

    # ---- folded BatchNorm1d (training-mode batch stats) + ReLU ---------------
    def bn_relu(v, gamma, beta):
        inv_n = 1.0 / v.shape[0]
        mean = jnp.sum(v, axis=0, keepdims=True) * inv_n
        var = jnp.maximum(jnp.sum(v * v, axis=0, keepdims=True) * inv_n - mean * mean, 0.0)
        scale = gamma * jax.lax.rsqrt(var + BN_EPS)
        shift = beta - mean * scale
        return jnp.maximum(v * scale + shift, 0.0)

    hb = bn_relu(h2, bn_g_ref[...], bn_b_ref[...])
    # fc_0 = Linear(1, C): (N,1)*(1,C) broadcast == matmul with inner dim 1
    e = edges_ref[...] * w0_ref[...] + b0_ref[...]
    eb = bn_relu(e, be_g_ref[...], be_b_ref[...])
    db = bn_relu(demb_ref[...], bd_g_ref[...], bd_b_ref[...])

    # ---- fc_2 over concat [h | e | d]: 3 accumulating dots, one f32 acc ------
    wcat = wcat_ref[...]
    out = (jnp.dot(hb, wcat[0:c_out], preferred_element_type=jnp.float32)
           + jnp.dot(eb, wcat[c_out:2 * c_out], preferred_element_type=jnp.float32)
           + jnp.dot(db, wcat[2 * c_out:3 * c_out], preferred_element_type=jnp.float32)
           + bcat_ref[...])

    # ---- F.normalize(dim=1) ---------------------------------------------------
    nrm = jnp.sqrt(jnp.sum(out * out, axis=1, keepdims=True))
    emb = out / jnp.maximum(nrm, NORM_EPS)
    embs_ref[...] = emb

    # ---- MoCo logits epilogue (q rows carried across grid steps) -------------
    rows = emb[row_off:row_off + batch]                       # static (B, C) slice

    @pl.when(g == 0)
    def _():
        q_sc[...] = rows                                      # stash q rows

    @pl.when(g == pl.num_programs(0) - 1)
    def _():
        q = q_sc[...]                                         # q rows (from step 0)
        k = rows                                              # k rows (this step)
        lpos_ref[...] = jnp.sum(q * k, axis=1, keepdims=True) * INV_TEMP
        weight = jax.nn.sigmoid(qw_ref[...] * (16.0 / DIAMETER) - 6.0)
        lneg_ref[...] = (jnp.dot(q, queue_ref[...], preferred_element_type=jnp.float32)
                         * weight) * INV_TEMP


# -------------------------------- Glue ----------------------------------------
def build_norm_adj(edge_index, edge_weight, n):
    # Dense GCN normalization: A_hat = A + I, D^{-1/2} A_hat D^{-1/2}
    a = jnp.zeros((n, n), jnp.float32)
    a = a.at[edge_index[1], edge_index[0]].add(edge_weight)   # A[target, source]
    a = a + jnp.eye(n, dtype=jnp.float32)
    deg = a.sum(axis=1)
    dinv = jnp.where(deg > 0, jax.lax.rsqrt(deg), 0.0)
    return dinv[:, None] * a * dinv[None, :]


_STACKED_ORDER = ("w1", "b1", "w2", "b2", "bn_g", "bn_b", "be_g", "be_b",
                  "bd_g", "bd_b", "w0", "b0", "wcat", "bcat")


def moco_forward(params_q, params_k, buffers, idx, x, a_norm, edges, degree,
                 batch, dist, perm, dropout_key, m=0.99):
    n = x.shape[0]
    hidden = params_q["w1"].shape[1]
    c = params_q["w2"].shape[1]
    K = buffers["queue"].shape[1]
    row_off = idx * batch

    # momentum update of key encoder (q/k start identical -> exact no-op; kept for fidelity)
    params_k = jax.tree_util.tree_map(lambda pk, pq: pk * m + pq * (1.0 - m),
                                      params_k, params_q)

    # stack per-encoder weights along a leading [q, k] axis
    stacked_args = tuple(jnp.stack([params_q[nm], params_k[nm]], axis=0)
                         for nm in _STACKED_ORDER)
    dembs = jnp.stack([params_q["emb"][degree], params_k["emb"][degree]], axis=0)  # glue gather
    # dropout keep-masks for q / k encoder passes, pre-scaled by 1/keep_prob
    drop_masks = (jax.random.bernoulli(dropout_key, KEEP_PROB, (2, n, hidden))
                  .astype(jnp.float32) * (1.0 / KEEP_PROB))
    stacked_args = stacked_args + (dembs, drop_masks)

    p = jax.lax.dynamic_slice_in_dim(perm, row_off, batch, axis=0)
    qw_rows = buffers["queue_w"][p]                           # (B, K) gather (glue)
    w = jax.lax.dynamic_slice_in_dim(dist, row_off, batch, axis=0)

    shared_args = (a_norm, x, edges, buffers["queue"], qw_rows)
    in_specs = ([_shared_spec(a.shape) for a in shared_args]
                + [_stacked_spec(a.shape[1:]) for a in stacked_args])

    kernel = functools.partial(_fused_moco_kernel, c_out=c,
                               batch=batch, row_off=row_off)

    embs, l_pos, l_neg = pl.pallas_call(
        kernel,
        grid_spec=pltpu.PrefetchScalarGridSpec(
            num_scalar_prefetch=0,
            grid=(2,),                                        # 0 = q encoder, 1 = k encoder
            in_specs=in_specs,
            out_specs=(
                pl.BlockSpec((None, n, c), lambda g: (g, 0, 0)),
                pl.BlockSpec((batch, 1), lambda g: (0, 0)),
                pl.BlockSpec((batch, K), lambda g: (0, 0)),
            ),
            scratch_shapes=[pltpu.VMEM((batch, c), jnp.float32)],
        ),
        out_shape=(
            jax.ShapeDtypeStruct((2, n, c), jnp.float32),
            jax.ShapeDtypeStruct((batch, 1), jnp.float32),
            jax.ShapeDtypeStruct((batch, K), jnp.float32),
        ),
        # q -> k carry via scratch forces sequential grid (must stay "arbitrary")
        compiler_params=pltpu.CompilerParams(dimension_semantics=("arbitrary",)),
    )(*shared_args, *stacked_args)

    embs_q = embs[0]
    k_rows = jax.lax.dynamic_slice_in_dim(embs[1], row_off, batch, axis=0)
    logits = jnp.concatenate([l_pos, l_neg], axis=1)          # lane concat in glue, not in-kernel
    labels = jnp.zeros((batch,), dtype=jnp.int32)             # torch.long -> int32 (no x64)

    # _dequeue_and_enqueue: functional buffer update (in-place mutation in torch)
    ptr = buffers["queue_ptr"]
    queue_new = jax.lax.dynamic_update_slice(buffers["queue"], k_rows.T, (0, ptr))
    queue_w_new = jax.lax.dynamic_update_slice(buffers["queue_w"], w.T, (0, ptr))
    new_buffers = dict(queue=queue_new, queue_w=queue_w_new,
                       queue_ptr=(ptr + batch) % K)
    return embs_q, logits, labels, params_k, new_buffers


def init_gcn_params(key, dim_in, dim_hidden, dim_out):
    ks = jax.random.split(key, 7)

    def u(k, shape, scale):
        return jax.random.uniform(k, shape, jnp.float32, -scale, scale)

    return dict(
        w1=u(ks[0], (dim_in, dim_hidden), dim_in ** -0.5),
        b1=jnp.zeros((1, dim_hidden), jnp.float32),
        w2=u(ks[1], (dim_hidden, dim_out), dim_hidden ** -0.5),
        b2=jnp.zeros((1, dim_out), jnp.float32),
        bn_g=jnp.ones((1, dim_out), jnp.float32), bn_b=jnp.zeros((1, dim_out), jnp.float32),
        be_g=jnp.ones((1, dim_out), jnp.float32), be_b=jnp.zeros((1, dim_out), jnp.float32),
        bd_g=jnp.ones((1, dim_out), jnp.float32), bd_b=jnp.zeros((1, dim_out), jnp.float32),
        w0=u(ks[2], (1, dim_out), 1.0),
        b0=u(ks[3], (1, dim_out), 1.0),
        emb=jax.random.normal(ks[4], (500, dim_out), jnp.float32),  # nn.Embedding(500, C)
        wcat=u(ks[5], (3 * dim_out, dim_out), (3 * dim_out) ** -0.5),
        bcat=u(ks[6], (1, dim_out), (3 * dim_out) ** -0.5),
    )


if __name__ == "__main__":
    N, DIM_IN, DIM_HIDDEN, DIM_OUT = 64, 8, 16, 32
    K, BATCH, M = 32, 8, 0.99
    E = 128

    key = jax.random.PRNGKey(0)
    (k_param, k_buf, k_x, k_ei, k_ew, k_edge,
     k_deg, k_dist, k_perm, k_drop) = jax.random.split(key, 10)

    params_q = init_gcn_params(k_param, DIM_IN, DIM_HIDDEN, DIM_OUT)
    params_k = jax.tree_util.tree_map(lambda t: t, params_q)  # k_net initialized as copy of q_net

    kq, kw = jax.random.split(k_buf)
    queue = jax.random.normal(kq, (DIM_OUT, K), jnp.float32)
    queue = queue / jnp.maximum(jnp.sqrt(jnp.sum(queue ** 2, axis=0, keepdims=True)), NORM_EPS)
    buffers = dict(queue=queue,
                   queue_w=jax.random.uniform(kw, (N, K), jnp.float32),
                   queue_ptr=jnp.array(0, jnp.int32))

    x = jax.random.normal(k_x, (N, DIM_IN), jnp.float32)
    src = jax.random.randint(k_ei, (E,), 0, N)
    dst = jax.random.randint(jax.random.fold_in(k_ei, 1), (E,), 0, N)
    edge_index = jnp.stack([src, dst])
    edge_weight = jax.random.uniform(k_ew, (E,), jnp.float32)
    a_norm = build_norm_adj(edge_index, edge_weight, N)

    edges_feat = jax.random.uniform(k_edge, (N, 1), jnp.float32)
    degree = jax.random.randint(k_deg, (N,), 0, 500)
    dist = jax.random.uniform(k_dist, (N, N), jnp.float32)
    perm = jax.random.permutation(k_perm, N)

    embs_q, logits, labels, params_k_new, new_buffers = moco_forward(
        params_q, params_k, buffers, idx=0, x=x, a_norm=a_norm, edges=edges_feat,
        degree=degree, batch=BATCH, dist=dist, perm=perm, dropout_key=k_drop, m=M)

    jax.block_until_ready((embs_q, logits, labels, new_buffers["queue"]))
    assert embs_q.shape == (N, DIM_OUT)
    assert logits.shape == (BATCH, 1 + K)
    assert labels.shape == (BATCH,)
    assert bool(jnp.all(jnp.isfinite(embs_q))) and bool(jnp.all(jnp.isfinite(logits)))
    print("KERNEL_OK")
</pallas_src>

<mosaic_0001>
module attributes {stable_mosaic.version = 11 : i64} {
  func.func @_fused_moco_kernel(%arg0: i32, %arg1: memref<64x64xf32, #tpu.memory_space<vmem>>, %arg2: memref<64x8xf32, #tpu.memory_space<vmem>>, %arg3: memref<64x1xf32, #tpu.memory_space<vmem>>, %arg4: memref<32x32xf32, #tpu.memory_space<vmem>>, %arg5: memref<8x32xf32, #tpu.memory_space<vmem>>, %arg6: memref<1x8x16xf32, #tpu.memory_space<vmem>>, %arg7: memref<1x1x16xf32, #tpu.memory_space<vmem>>, %arg8: memref<1x16x32xf32, #tpu.memory_space<vmem>>, %arg9: memref<1x1x32xf32, #tpu.memory_space<vmem>>, %arg10: memref<1x1x32xf32, #tpu.memory_space<vmem>>, %arg11: memref<1x1x32xf32, #tpu.memory_space<vmem>>, %arg12: memref<1x1x32xf32, #tpu.memory_space<vmem>>, %arg13: memref<1x1x32xf32, #tpu.memory_space<vmem>>, %arg14: memref<1x1x32xf32, #tpu.memory_space<vmem>>, %arg15: memref<1x1x32xf32, #tpu.memory_space<vmem>>, %arg16: memref<1x1x32xf32, #tpu.memory_space<vmem>>, %arg17: memref<1x1x32xf32, #tpu.memory_space<vmem>>, %arg18: memref<1x96x32xf32, #tpu.memory_space<vmem>>, %arg19: memref<1x1x32xf32, #tpu.memory_space<vmem>>, %arg20: memref<1x64x32xf32, #tpu.memory_space<vmem>>, %arg21: memref<1x64x16xf32, #tpu.memory_space<vmem>>, %arg22: memref<1x64x32xf32, #tpu.memory_space<vmem>>, %arg23: memref<8x1xf32, #tpu.memory_space<vmem>>, %arg24: memref<8x32xf32, #tpu.memory_space<vmem>>, %arg25: memref<8x32xf32, #tpu.memory_space<vmem>>) attributes {dimension_semantics = [#tpu.dimension_semantics<arbitrary>], iteration_bounds = array<i64: 2>, scalar_prefetch = 0 : i64, scratch_operands = 1 : i64, tpu.core_type = #tpu.core_type<tc>, window_params = [{pipeline_mode = #tpu.pipeline_mode<synchronous>, transform_indices = @transform_0, window_bounds = array<i64: 64, 64>}, {pipeline_mode = #tpu.pipeline_mode<synchronous>, transform_indices = @transform_1, window_bounds = array<i64: 64, 8>}, {pipeline_mode = #tpu.pipeline_mode<synchronous>, transform_indices = @transform_2, window_bounds = array<i64: 64, 1>}, {pipeline_mode = #tpu.pipeline_mode<synchronous>, transform_indices = @transform_3, window_bounds = array<i64: 32, 32>}, {pipeline_mode = #tpu.pipeline_mode<synchronous>, transform_indices = @transform_4, window_bounds = array<i64: 8, 32>}, {transform_indices = @transform_5, window_bounds = array<i64: 1, 8, 16>}, {transform_indices = @transform_6, window_bounds = array<i64: 1, 1, 16>}, {transform_indices = @transform_7, window_bounds = array<i64: 1, 16, 32>}, {transform_indices = @transform_8, window_bounds = array<i64: 1, 1, 32>}, {transform_indices = @transform_9, window_bounds = array<i64: 1, 1, 32>}, {transform_indices = @transform_10, window_bounds = array<i64: 1, 1, 32>}, {transform_indices = @transform_11, window_bounds = array<i64: 1, 1, 32>}, {transform_indices = @transform_12, window_bounds = array<i64: 1, 1, 32>}, {transform_indices = @transform_13, window_bounds = array<i64: 1, 1, 32>}, {transform_indices = @transform_14, window_bounds = array<i64: 1, 1, 32>}, {transform_indices = @transform_15, window_bounds = array<i64: 1, 1, 32>}, {transform_indices = @transform_16, window_bounds = array<i64: 1, 1, 32>}, {transform_indices = @transform_17, window_bounds = array<i64: 1, 96, 32>}, {transform_indices = @transform_18, window_bounds = array<i64: 1, 1, 32>}, {transform_indices = @transform_19, window_bounds = array<i64: 1, 64, 32>}, {transform_indices = @transform_20, window_bounds = array<i64: 1, 64, 16>}, {transform_indices = @transform_21, window_bounds = array<i64: 1, 64, 32>}, {pipeline_mode = #tpu.pipeline_mode<synchronous>, transform_indices = @transform_22, window_bounds = array<i64: 8, 1>}, {pipeline_mode = #tpu.pipeline_mode<synchronous>, transform_indices = @transform_23, window_bounds = array<i64: 8, 32>}]} {
    %c0 = arith.constant 0 : index
    %c0_0 = arith.constant 0 : index
    %0 = vector.load %arg2[%c0, %c0_0] : memref<64x8xf32, #tpu.memory_space<vmem>>, vector<64x8xf32>
    %c0_1 = arith.constant 0 : index
    %c0_2 = arith.constant 0 : index
    %c0_3 = arith.constant 0 : index
    %1 = vector.load %arg6[%c0_1, %c0_2, %c0_3] : memref<1x8x16xf32, #tpu.memory_space<vmem>>, vector<1x8x16xf32>
    %2 = vector.shape_cast %1 : vector<1x8x16xf32> to vector<8x16xf32>
    %cst = arith.constant dense<0.000000e+00> : vector<64x16xf32>
    %3 = tpu.matmul %0, %2, %cst {dimension_numbers = #tpu.dot_dimension_numbers<[1], [0], [0], [1], [0, 0, 1, 1], [], []>} : vector<64x8xf32>, vector<8x16xf32>, vector<64x16xf32> -> vector<64x16xf32>
    %c0_4 = arith.constant 0 : index
    %c0_5 = arith.constant 0 : index
    %4 = vector.load %arg1[%c0_4, %c0_5] : memref<64x64xf32, #tpu.memory_space<vmem>>, vector<64x64xf32>
    %cst_6 = arith.constant dense<0.000000e+00> : vector<64x16xf32>
    %5 = tpu.matmul %4, %3, %cst_6 {dimension_numbers = #tpu.dot_dimension_numbers<[1], [0], [0], [1], [0, 0, 1, 1], [], []>} : vector<64x64xf32>, vector<64x16xf32>, vector<64x16xf32> -> vector<64x16xf32>
    %c0_7 = arith.constant 0 : index
    %c0_8 = arith.constant 0 : index
    %c0_9 = arith.constant 0 : index
    %6 = vector.load %arg7[%c0_7, %c0_8, %c0_9] : memref<1x1x16xf32, #tpu.memory_space<vmem>>, vector<1x1x16xf32>
    %7 = vector.shape_cast %6 : vector<1x1x16xf32> to vector<1x16xf32>
    %8 = vector.broadcast %7 : vector<1x16xf32> to vector<64x16xf32>
    %9 = arith.addf %5, %8 : vector<64x16xf32>
    %cst_10 = arith.constant 0.000000e+00 : f32
    %10 = vector.broadcast %cst_10 : f32 to vector<64x16xf32>
    %11 = arith.maximumf %9, %10 : vector<64x16xf32>
    %c0_11 = arith.constant 0 : index
    %c0_12 = arith.constant 0 : index
    %c0_13 = arith.constant 0 : index
    %12 = vector.load %arg21[%c0_11, %c0_12, %c0_13] : memref<1x64x16xf32, #tpu.memory_space<vmem>>, vector<1x64x16xf32>
    %13 = vector.shape_cast %12 : vector<1x64x16xf32> to vector<64x16xf32>
    %14 = arith.mulf %11, %13 : vector<64x16xf32>
    %c0_14 = arith.constant 0 : index
    %c0_15 = arith.constant 0 : index
    %c0_16 = arith.constant 0 : index
    %15 = vector.load %arg8[%c0_14, %c0_15, %c0_16] : memref<1x16x32xf32, #tpu.memory_space<vmem>>, vector<1x16x32xf32>
    %16 = vector.shape_cast %15 : vector<1x16x32xf32> to vector<16x32xf32>
    %cst_17 = arith.constant dense<0.000000e+00> : vector<64x32xf32>
    %17 = tpu.matmul %14, %16, %cst_17 {dimension_numbers = #tpu.dot_dimension_numbers<[1], [0], [0], [1], [0, 0, 1, 1], [], []>} : vector<64x16xf32>, vector<16x32xf32>, vector<64x32xf32> -> vector<64x32xf32>
    %c0_18 = arith.constant 0 : index
    %c0_19 = arith.constant 0 : index
    %18 = vector.load %arg1[%c0_18, %c0_19] : memref<64x64xf32, #tpu.memory_space<vmem>>, vector<64x64xf32>
    %cst_20 = arith.constant dense<0.000000e+00> : vector<64x32xf32>
    %19 = tpu.matmul %18, %17, %cst_20 {dimension_numbers = #tpu.dot_dimension_numbers<[1], [0], [0], [1], [0, 0, 1, 1], [], []>} : vector<64x64xf32>, vector<64x32xf32>, vector<64x32xf32> -> vector<64x32xf32>
    %c0_21 = arith.constant 0 : index
    %c0_22 = arith.constant 0 : index
    %c0_23 = arith.constant 0 : index
    %20 = vector.load %arg9[%c0_21, %c0_22, %c0_23] : memref<1x1x32xf32, #tpu.memory_space<vmem>>, vector<1x1x32xf32>
    %21 = vector.shape_cast %20 : vector<1x1x32xf32> to vector<1x32xf32>
    %22 = vector.broadcast %21 : vector<1x32xf32> to vector<64x32xf32>
    %23 = arith.addf %19, %22 : vector<64x32xf32>
    %c0_24 = arith.constant 0 : index
    %c0_25 = arith.constant 0 : index
    %c0_26 = arith.constant 0 : index
    %24 = vector.load %arg10[%c0_24, %c0_25, %c0_26] : memref<1x1x32xf32, #tpu.memory_space<vmem>>, vector<1x1x32xf32>
    %25 = vector.shape_cast %24 : vector<1x1x32xf32> to vector<1x32xf32>
    %c0_27 = arith.constant 0 : index
    %c0_28 = arith.constant 0 : index
    %c0_29 = arith.constant 0 : index
    %26 = vector.load %arg11[%c0_27, %c0_28, %c0_29] : memref<1x1x32xf32, #tpu.memory_space<vmem>>, vector<1x1x32xf32>
    %27 = vector.shape_cast %26 : vector<1x1x32xf32> to vector<1x32xf32>
    %cst_30 = arith.constant dense<0.000000e+00> : vector<32xf32>
    %28 = vector.multi_reduction <add>, %23, %cst_30 [0] : vector<64x32xf32> to vector<32xf32>
    %29 = vector.shape_cast %28 : vector<32xf32> to vector<1x32xf32>
    %cst_31 = arith.constant 1.562500e-02 : f32
    %30 = vector.broadcast %cst_31 : f32 to vector<1x32xf32>
    %31 = arith.mulf %29, %30 : vector<1x32xf32>
    %32 = arith.mulf %23, %23 : vector<64x32xf32>
    %cst_32 = arith.constant dense<0.000000e+00> : vector<32xf32>
    %33 = vector.multi_reduction <add>, %32, %cst_32 [0] : vector<64x32xf32> to vector<32xf32>
    %34 = vector.shape_cast %33 : vector<32xf32> to vector<1x32xf32>
    %cst_33 = arith.constant 1.562500e-02 : f32
    %35 = vector.broadcast %cst_33 : f32 to vector<1x32xf32>
    %36 = arith.mulf %34, %35 : vector<1x32xf32>
    %37 = arith.mulf %31, %31 : vector<1x32xf32>
    %38 = arith.subf %36, %37 : vector<1x32xf32>
    %cst_34 = arith.constant 0.000000e+00 : f32
    %39 = vector.broadcast %cst_34 : f32 to vector<1x32xf32>
    %40 = arith.maximumf %38, %39 : vector<1x32xf32>
    %cst_35 = arith.constant 9.99999974E-6 : f32
    %41 = vector.broadcast %cst_35 : f32 to vector<1x32xf32>
    %42 = arith.addf %40, %41 : vector<1x32xf32>
    %43 = math.rsqrt %42 : vector<1x32xf32>
    %44 = arith.mulf %25, %43 : vector<1x32xf32>
    %45 = arith.mulf %31, %44 : vector<1x32xf32>
    %46 = arith.subf %27, %45 : vector<1x32xf32>
    %47 = vector.broadcast %44 : vector<1x32xf32> to vector<64x32xf32>
    %48 = arith.mulf %23, %47 : vector<64x32xf32>
    %49 = vector.broadcast %46 : vector<1x32xf32> to vector<64x32xf32>
    %50 = arith.addf %48, %49 : vector<64x32xf32>
    %cst_36 = arith.constant 0.000000e+00 : f32
    %51 = vector.broadcast %cst_36 : f32 to vector<64x32xf32>
    %52 = arith.maximumf %50, %51 : vector<64x32xf32>
    %c0_37 = arith.constant 0 : index
    %c0_38 = arith.constant 0 : index
    %53 = vector.load %arg3[%c0_37, %c0_38] : memref<64x1xf32, #tpu.memory_space<vmem>>, vector<64x1xf32>
    %c0_39 = arith.constant 0 : index
    %c0_40 = arith.constant 0 : index
    %c0_41 = arith.constant 0 : index
    %54 = vector.load %arg16[%c0_39, %c0_40, %c0_41] : memref<1x1x32xf32, #tpu.memory_space<vmem>>, vector<1x1x32xf32>
    %55 = vector.shape_cast %54 : vector<1x1x32xf32> to vector<1x32xf32>
    %56 = vector.broadcast %53 : vector<64x1xf32> to vector<64x32xf32>
    %57 = vector.broadcast %55 : vector<1x32xf32> to vector<64x32xf32>
    %58 = arith.mulf %56, %57 : vector<64x32xf32>
    %c0_42 = arith.constant 0 : index
    %c0_43 = arith.constant 0 : index
    %c0_44 = arith.constant 0 : index
    %59 = vector.load %arg17[%c0_42, %c0_43, %c0_44] : memref<1x1x32xf32, #tpu.memory_space<vmem>>, vector<1x1x32xf32>
    %60 = vector.shape_cast %59 : vector<1x1x32xf32> to vector<1x32xf32>
    %61 = vector.broadcast %60 : vector<1x32xf32> to vector<64x32xf32>
    %62 = arith.addf %58, %61 : vector<64x32xf32>
    %c0_45 = arith.constant 0 : index
    %c0_46 = arith.constant 0 : index
    %c0_47 = arith.constant 0 : index
    %63 = vector.load %arg12[%c0_45, %c0_46, %c0_47] : memref<1x1x32xf32, #tpu.memory_space<vmem>>, vector<1x1x32xf32>
    %64 = vector.shape_cast %63 : vector<1x1x32xf32> to vector<1x32xf32>
    %c0_48 = arith.constant 0 : index
    %c0_49 = arith.constant 0 : index
    %c0_50 = arith.constant 0 : index
    %65 = vector.load %arg13[%c0_48, %c0_49, %c0_50] : memref<1x1x32xf32, #tpu.memory_space<vmem>>, vector<1x1x32xf32>
    %66 = vector.shape_cast %65 : vector<1x1x32xf32> to vector<1x32xf32>
    %cst_51 = arith.constant dense<0.000000e+00> : vector<32xf32>
    %67 = vector.multi_reduction <add>, %62, %cst_51 [0] : vector<64x32xf32> to vector<32xf32>
    %68 = vector.shape_cast %67 : vector<32xf32> to vector<1x32xf32>
    %cst_52 = arith.constant 1.562500e-02 : f32
    %69 = vector.broadcast %cst_52 : f32 to vector<1x32xf32>
    %70 = arith.mulf %68, %69 : vector<1x32xf32>
    %71 = arith.mulf %62, %62 : vector<64x32xf32>
    %cst_53 = arith.constant dense<0.000000e+00> : vector<32xf32>
    %72 = vector.multi_reduction <add>, %71, %cst_53 [0] : vector<64x32xf32> to vector<32xf32>
    %73 = vector.shape_cast %72 : vector<32xf32> to vector<1x32xf32>
    %cst_54 = arith.constant 1.562500e-02 : f32
    %74 = vector.broadcast %cst_54 : f32 to vector<1x32xf32>
    %75 = arith.mulf %73, %74 : vector<1x32xf32>
    %76 = arith.mulf %70, %70 : vector<1x32xf32>
    %77 = arith.subf %75, %76 : vector<1x32xf32>
    %cst_55 = arith.constant 0.000000e+00 : f32
    %78 = vector.broadcast %cst_55 : f32 to vector<1x32xf32>
    %79 = arith.maximumf %77, %78 : vector<1x32xf32>
    %cst_56 = arith.constant 9.99999974E-6 : f32
    %80 = vector.broadcast %cst_56 : f32 to vector<1x32xf32>
    %81 = arith.addf %79, %80 : vector<1x32xf32>
    %82 = math.rsqrt %81 : vector<1x32xf32>
    %83 = arith.mulf %64, %82 : vector<1x32xf32>
    %84 = arith.mulf %70, %83 : vector<1x32xf32>
    %85 = arith.subf %66, %84 : vector<1x32xf32>
    %86 = vector.broadcast %83 : vector<1x32xf32> to vector<64x32xf32>
    %87 = arith.mulf %62, %86 : vector<64x32xf32>
    %88 = vector.broadcast %85 : vector<1x32xf32> to vector<64x32xf32>
    %89 = arith.addf %87, %88 : vector<64x32xf32>
    %cst_57 = arith.constant 0.000000e+00 : f32
    %90 = vector.broadcast %cst_57 : f32 to vector<64x32xf32>
    %91 = arith.maximumf %89, %90 : vector<64x32xf32>
    %c0_58 = arith.constant 0 : index
    %c0_59 = arith.constant 0 : index
    %c0_60 = arith.constant 0 : index
    %92 = vector.load %arg20[%c0_58, %c0_59, %c0_60] : memref<1x64x32xf32, #tpu.memory_space<vmem>>, vector<1x64x32xf32>
    %93 = vector.shape_cast %92 : vector<1x64x32xf32> to vector<64x32xf32>
    %c0_61 = arith.constant 0 : index
    %c0_62 = arith.constant 0 : index
    %c0_63 = arith.constant 0 : index
    %94 = vector.load %arg14[%c0_61, %c0_62, %c0_63] : memref<1x1x32xf32, #tpu.memory_space<vmem>>, vector<1x1x32xf32>
    %95 = vector.shape_cast %94 : vector<1x1x32xf32> to vector<1x32xf32>
    %c0_64 = arith.constant 0 : index
    %c0_65 = arith.constant 0 : index
    %c0_66 = arith.constant 0 : index
    %96 = vector.load %arg15[%c0_64, %c0_65, %c0_66] : memref<1x1x32xf32, #tpu.memory_space<vmem>>, vector<1x1x32xf32>
    %97 = vector.shape_cast %96 : vector<1x1x32xf32> to vector<1x32xf32>
    %cst_67 = arith.constant dense<0.000000e+00> : vector<32xf32>
    %98 = vector.multi_reduction <add>, %93, %cst_67 [0] : vector<64x32xf32> to vector<32xf32>
    %99 = vector.shape_cast %98 : vector<32xf32> to vector<1x32xf32>
    %cst_68 = arith.constant 1.562500e-02 : f32
    %100 = vector.broadcast %cst_68 : f32 to vector<1x32xf32>
    %101 = arith.mulf %99, %100 : vector<1x32xf32>
    %102 = arith.mulf %93, %93 : vector<64x32xf32>
    %cst_69 = arith.constant dense<0.000000e+00> : vector<32xf32>
    %103 = vector.multi_reduction <add>, %102, %cst_69 [0] : vector<64x32xf32> to vector<32xf32>
    %104 = vector.shape_cast %103 : vector<32xf32> to vector<1x32xf32>
    %cst_70 = arith.constant 1.562500e-02 : f32
    %105 = vector.broadcast %cst_70 : f32 to vector<1x32xf32>
    %106 = arith.mulf %104, %105 : vector<1x32xf32>
    %107 = arith.mulf %101, %101 : vector<1x32xf32>
    %108 = arith.subf %106, %107 : vector<1x32xf32>
    %cst_71 = arith.constant 0.000000e+00 : f32
    %109 = vector.broadcast %cst_71 : f32 to vector<1x32xf32>
    %110 = arith.maximumf %108, %109 : vector<1x32xf32>
    %cst_72 = arith.constant 9.99999974E-6 : f32
    %111 = vector.broadcast %cst_72 : f32 to vector<1x32xf32>
    %112 = arith.addf %110, %111 : vector<1x32xf32>
    %113 = math.rsqrt %112 : vector<1x32xf32>
    %114 = arith.mulf %95, %113 : vector<1x32xf32>
    %115 = arith.mulf %101, %114 : vector<1x32xf32>
    %116 = arith.subf %97, %115 : vector<1x32xf32>
    %117 = vector.broadcast %114 : vector<1x32xf32> to vector<64x32xf32>
    %118 = arith.mulf %93, %117 : vector<64x32xf32>
    %119 = vector.broadcast %116 : vector<1x32xf32> to vector<64x32xf32>
    %120 = arith.addf %118, %119 : vector<64x32xf32>
    %cst_73 = arith.constant 0.000000e+00 : f32
    %121 = vector.broadcast %cst_73 : f32 to vector<64x32xf32>
    %122 = arith.maximumf %120, %121 : vector<64x32xf32>
    %c0_74 = arith.constant 0 : index
    %c0_75 = arith.constant 0 : index
    %c0_76 = arith.constant 0 : index
    %123 = vector.load %arg18[%c0_74, %c0_75, %c0_76] : memref<1x96x32xf32, #tpu.memory_space<vmem>>, vector<1x96x32xf32>
    %124 = vector.shape_cast %123 : vector<1x96x32xf32> to vector<96x32xf32>
    %125 = vector.extract_strided_slice %124 {offsets = [0, 0], sizes = [32, 32], strides = [1, 1]} : vector<96x32xf32> to vector<32x32xf32>
    %cst_77 = arith.constant dense<0.000000e+00> : vector<64x32xf32>
    %126 = tpu.matmul %52, %125, %cst_77 {dimension_numbers = #tpu.dot_dimension_numbers<[1], [0], [0], [1], [0, 0, 1, 1], [], []>} : vector<64x32xf32>, vector<32x32xf32>, vector<64x32xf32> -> vector<64x32xf32>
    %127 = vector.extract_strided_slice %124 {offsets = [32, 0], sizes = [32, 32], strides = [1, 1]} : vector<96x32xf32> to vector<32x32xf32>
    %cst_78 = arith.constant dense<0.000000e+00> : vector<64x32xf32>
    %128 = tpu.matmul %91, %127, %cst_78 {dimension_numbers = #tpu.dot_dimension_numbers<[1], [0], [0], [1], [0, 0, 1, 1], [], []>} : vector<64x32xf32>, vector<32x32xf32>, vector<64x32xf32> -> vector<64x32xf32>
    %129 = arith.addf %126, %128 : vector<64x32xf32>
    %130 = vector.extract_strided_slice %124 {offsets = [64, 0], sizes = [32, 32], strides = [1, 1]} : vector<96x32xf32> to vector<32x32xf32>
    %cst_79 = arith.constant dense<0.000000e+00> : vector<64x32xf32>
    %131 = tpu.matmul %122, %130, %cst_79 {dimension_numbers = #tpu.dot_dimension_numbers<[1], [0], [0], [1], [0, 0, 1, 1], [], []>} : vector<64x32xf32>, vector<32x32xf32>, vector<64x32xf32> -> vector<64x32xf32>
    %132 = arith.addf %129, %131 : vector<64x32xf32>
    %c0_80 = arith.constant 0 : index
    %c0_81 = arith.constant 0 : index
    %c0_82 = arith.constant 0 : index
    %133 = vector.load %arg19[%c0_80, %c0_81, %c0_82] : memref<1x1x32xf32, #tpu.memory_space<vmem>>, vector<1x1x32xf32>
    %134 = vector.shape_cast %133 : vector<1x1x32xf32> to vector<1x32xf32>
    %135 = vector.broadcast %134 : vector<1x32xf32> to vector<64x32xf32>
    %136 = arith.addf %132, %135 : vector<64x32xf32>
    %137 = arith.mulf %136, %136 : vector<64x32xf32>
    %cst_83 = arith.constant dense<0.000000e+00> : vector<64xf32>
    %138 = vector.multi_reduction <add>, %137, %cst_83 [1] : vector<64x32xf32> to vector<64xf32>
    %139 = vector.shape_cast %138 : vector<64xf32> to vector<64x1xf32>
    %140 = math.sqrt %139 : vector<64x1xf32>
    %cst_84 = arith.constant 9.99999996E-13 : f32
    %141 = vector.broadcast %cst_84 : f32 to vector<64x1xf32>
    %142 = arith.maximumf %140, %141 : vector<64x1xf32>
    %143 = vector.broadcast %142 : vector<64x1xf32> to vector<64x32xf32>
    %144 = arith.divf %136, %143 : vector<64x32xf32>
    %c0_85 = arith.constant 0 : index
    %c0_86 = arith.constant 0 : index
    %c0_87 = arith.constant 0 : index
    %145 = vector.load %arg22[%c0_85, %c0_86, %c0_87] : memref<1x64x32xf32, #tpu.memory_space<vmem>>, vector<1x64x32xf32>
    %146 = vector.shape_cast %145 : vector<1x64x32xf32> to vector<64x32xf32>
    %147 = vector.shape_cast %144 : vector<64x32xf32> to vector<1x64x32xf32>
    tpu.vector_store %arg22[%c0_85, %c0_86, %c0_87], %147 {strides = array<i32>} : memref<1x64x32xf32, #tpu.memory_space<vmem>>, vector<1x64x32xf32>,
    %148 = vector.extract_strided_slice %144 {offsets = [0, 0], sizes = [8, 32], strides = [1, 1]} : vector<64x32xf32> to vector<8x32xf32>
    %c0_i32 = arith.constant 0 : i32
    %149 = arith.cmpi eq, %arg0, %c0_i32 : i32
    %150 = arith.extui %149 : i1 to i32
    %c0_i32_88 = arith.constant 0 : i32
    %151 = arith.cmpi ne, %150, %c0_i32_88 : i32
    scf.if %151 {
      %c0_90 = arith.constant 0 : index
      %c0_91 = arith.constant 0 : index
      %155 = vector.load %arg25[%c0_90, %c0_91] : memref<8x32xf32, #tpu.memory_space<vmem>>, vector<8x32xf32>
      tpu.vector_store %arg25[%c0_90, %c0_91], %148 {strides = array<i32>} : memref<8x32xf32, #tpu.memory_space<vmem>>, vector<8x32xf32>,
    } else {
    }
    %c1_i32 = arith.constant 1 : i32
    %152 = arith.cmpi eq, %arg0, %c1_i32 : i32
    %153 = arith.extui %152 : i1 to i32
    %c0_i32_89 = arith.constant 0 : i32
    %154 = arith.cmpi ne, %153, %c0_i32_89 : i32
    scf.if %154 {
      %c0_90 = arith.constant 0 : index
      %c0_91 = arith.constant 0 : index
      %155 = vector.load %arg25[%c0_90, %c0_91] : memref<8x32xf32, #tpu.memory_space<vmem>>, vector<8x32xf32>
      %156 = arith.mulf %155, %148 : vector<8x32xf32>
      %cst_92 = arith.constant dense<0.000000e+00> : vector<8xf32>
      %157 = vector.multi_reduction <add>, %156, %cst_92 [1] : vector<8x32xf32> to vector<8xf32>
      %158 = vector.shape_cast %157 : vector<8xf32> to vector<8x1xf32>
      %cst_93 = arith.constant 1.000000e+02 : f32
      %159 = vector.broadcast %cst_93 : f32 to vector<8x1xf32>
      %160 = arith.mulf %158, %159 : vector<8x1xf32>
      %c0_94 = arith.constant 0 : index
      %c0_95 = arith.constant 0 : index
      %161 = vector.load %arg23[%c0_94, %c0_95] : memref<8x1xf32, #tpu.memory_space<vmem>>, vector<8x1xf32>
      tpu.vector_store %arg23[%c0_94, %c0_95], %160 {strides = array<i32>} : memref<8x1xf32, #tpu.memory_space<vmem>>, vector<8x1xf32>,
      %c0_96 = arith.constant 0 : index
      %c0_97 = arith.constant 0 : index
      %162 = vector.load %arg5[%c0_96, %c0_97] : memref<8x32xf32, #tpu.memory_space<vmem>>, vector<8x32xf32>
      %cst_98 = arith.constant 1.000000e+00 : f32
      %163 = vector.broadcast %cst_98 : f32 to vector<8x32xf32>
      %164 = arith.mulf %162, %163 : vector<8x32xf32>
      %cst_99 = arith.constant 6.000000e+00 : f32
      %165 = vector.broadcast %cst_99 : f32 to vector<8x32xf32>
      %166 = arith.subf %164, %165 : vector<8x32xf32>
      %167 = arith.negf %166 : vector<8x32xf32>
      %168 = math.exp %167 : vector<8x32xf32>
      %cst_100 = arith.constant 1.000000e+00 : f32
      %169 = vector.broadcast %cst_100 : f32 to vector<8x32xf32>
      %170 = arith.addf %169, %168 : vector<8x32xf32>
      %171 = arith.divf %169, %170 : vector<8x32xf32>
      %c0_101 = arith.constant 0 : index
      %c0_102 = arith.constant 0 : index
      %172 = vector.load %arg4[%c0_101, %c0_102] : memref<32x32xf32, #tpu.memory_space<vmem>>, vector<32x32xf32>
      %cst_103 = arith.constant dense<0.000000e+00> : vector<8x32xf32>
      %173 = tpu.matmul %155, %172, %cst_103 {dimension_numbers = #tpu.dot_dimension_numbers<[1], [0], [0], [1], [0, 0, 1, 1], [], []>} : vector<8x32xf32>, vector<32x32xf32>, vector<8x32xf32> -> vector<8x32xf32>
      %174 = arith.mulf %173, %171 : vector<8x32xf32>
      %cst_104 = arith.constant 1.000000e+02 : f32
      %175 = vector.broadcast %cst_104 : f32 to vector<8x32xf32>
      %176 = arith.mulf %174, %175 : vector<8x32xf32>
      %c0_105 = arith.constant 0 : index
      %c0_106 = arith.constant 0 : index
      %177 = vector.load %arg24[%c0_105, %c0_106] : memref<8x32xf32, #tpu.memory_space<vmem>>, vector<8x32xf32>
      tpu.vector_store %arg24[%c0_105, %c0_106], %176 {strides = array<i32>} : memref<8x32xf32, #tpu.memory_space<vmem>>, vector<8x32xf32>,
    } else {
    }
    return
  }
  func.func @transform_0(%arg0: i32) -> (i32, i32) {
    %c0_i32 = arith.constant 0 : i32
    %c0_i32_0 = arith.constant 0 : i32
    %c0_i32_1 = arith.constant 0 : i32
    return %c0_i32, %c0_i32_0 : i32, i32
  }
  func.func @transform_1(%arg0: i32) -> (i32, i32) {
    %c0_i32 = arith.constant 0 : i32
    %c0_i32_0 = arith.constant 0 : i32
    %c0_i32_1 = arith.constant 0 : i32
    return %c0_i32, %c0_i32_0 : i32, i32
  }
  func.func @transform_2(%arg0: i32) -> (i32, i32) {
    %c0_i32 = arith.constant 0 : i32
    %c0_i32_0 = arith.constant 0 : i32
    %c0_i32_1 = arith.constant 0 : i32
    return %c0_i32, %c0_i32_0 : i32, i32
  }
  func.func @transform_3(%arg0: i32) -> (i32, i32) {
    %c0_i32 = arith.constant 0 : i32
    %c0_i32_0 = arith.constant 0 : i32
    %c0_i32_1 = arith.constant 0 : i32
    return %c0_i32, %c0_i32_0 : i32, i32
  }
  func.func @transform_4(%arg0: i32) -> (i32, i32) {
    %c0_i32 = arith.constant 0 : i32
    %c0_i32_0 = arith.constant 0 : i32
    %c0_i32_1 = arith.constant 0 : i32
    return %c0_i32, %c0_i32_0 : i32, i32
  }
  func.func @transform_5(%arg0: i32) -> (i32, i32, i32) {
    %c0_i32 = arith.constant 0 : i32
    %c0_i32_0 = arith.constant 0 : i32
    %c0_i32_1 = arith.constant 0 : i32
    return %arg0, %c0_i32, %c0_i32_0 : i32, i32, i32
  }
  func.func @transform_6(%arg0: i32) -> (i32, i32, i32) {
    %c0_i32 = arith.constant 0 : i32
    %c0_i32_0 = arith.constant 0 : i32
    %c0_i32_1 = arith.constant 0 : i32
    return %arg0, %c0_i32, %c0_i32_0 : i32, i32, i32
  }
  func.func @transform_7(%arg0: i32) -> (i32, i32, i32) {
    %c0_i32 = arith.constant 0 : i32
    %c0_i32_0 = arith.constant 0 : i32
    %c0_i32_1 = arith.constant 0 : i32
    return %arg0, %c0_i32, %c0_i32_0 : i32, i32, i32
  }
  func.func @transform_8(%arg0: i32) -> (i32, i32, i32) {
    %c0_i32 = arith.constant 0 : i32
    %c0_i32_0 = arith.constant 0 : i32
    %c0_i32_1 = arith.constant 0 : i32
    return %arg0, %c0_i32, %c0_i32_0 : i32, i32, i32
  }
  func.func @transform_9(%arg0: i32) -> (i32, i32, i32) {
    %c0_i32 = arith.constant 0 : i32
    %c0_i32_0 = arith.constant 0 : i32
    %c0_i32_1 = arith.constant 0 : i32
    return %arg0, %c0_i32, %c0_i32_0 : i32, i32, i32
  }
  func.func @transform_10(%arg0: i32) -> (i32, i32, i32) {
    %c0_i32 = arith.constant 0 : i32
    %c0_i32_0 = arith.constant 0 : i32
    %c0_i32_1 = arith.constant 0 : i32
    return %arg0, %c0_i32, %c0_i32_0 : i32, i32, i32
  }
  func.func @transform_11(%arg0: i32) -> (i32, i32, i32) {
    %c0_i32 = arith.constant 0 : i32
    %c0_i32_0 = arith.constant 0 : i32
    %c0_i32_1 = arith.constant 0 : i32
    return %arg0, %c0_i32, %c0_i32_0 : i32, i32, i32
  }
  func.func @transform_12(%arg0: i32) -> (i32, i32, i32) {
    %c0_i32 = arith.constant 0 : i32
    %c0_i32_0 = arith.constant 0 : i32
    %c0_i32_1 = arith.constant 0 : i32
    return %arg0, %c0_i32, %c0_i32_0 : i32, i32, i32
  }
  func.func @transform_13(%arg0: i32) -> (i32, i32, i32) {
    %c0_i32 = arith.constant 0 : i32
    %c0_i32_0 = arith.constant 0 : i32
    %c0_i32_1 = arith.constant 0 : i32
    return %arg0, %c0_i32, %c0_i32_0 : i32, i32, i32
  }
  func.func @transform_14(%arg0: i32) -> (i32, i32, i32) {
    %c0_i32 = arith.constant 0 : i32
    %c0_i32_0 = arith.constant 0 : i32
    %c0_i32_1 = arith.constant 0 : i32
    return %arg0, %c0_i32, %c0_i32_0 : i32, i32, i32
  }
  func.func @transform_15(%arg0: i32) -> (i32, i32, i32) {
    %c0_i32 = arith.constant 0 : i32
    %c0_i32_0 = arith.constant 0 : i32
    %c0_i32_1 = arith.constant 0 : i32
    return %arg0, %c0_i32, %c0_i32_0 : i32, i32, i32
  }
  func.func @transform_16(%arg0: i32) -> (i32, i32, i32) {
    %c0_i32 = arith.constant 0 : i32
    %c0_i32_0 = arith.constant 0 : i32
    %c0_i32_1 = arith.constant 0 : i32
    return %arg0, %c0_i32, %c0_i32_0 : i32, i32, i32
  }
  func.func @transform_17(%arg0: i32) -> (i32, i32, i32) {
    %c0_i32 = arith.constant 0 : i32
    %c0_i32_0 = arith.constant 0 : i32
    %c0_i32_1 = arith.constant 0 : i32
    return %arg0, %c0_i32, %c0_i32_0 : i32, i32, i32
  }
  func.func @transform_18(%arg0: i32) -> (i32, i32, i32) {
    %c0_i32 = arith.constant 0 : i32
    %c0_i32_0 = arith.constant 0 : i32
    %c0_i32_1 = arith.constant 0 : i32
    return %arg0, %c0_i32, %c0_i32_0 : i32, i32, i32
  }
  func.func @transform_19(%arg0: i32) -> (i32, i32, i32) {
    %c0_i32 = arith.constant 0 : i32
    %c0_i32_0 = arith.constant 0 : i32
    %c0_i32_1 = arith.constant 0 : i32
    return %arg0, %c0_i32, %c0_i32_0 : i32, i32, i32
  }
  func.func @transform_20(%arg0: i32) -> (i32, i32, i32) {
    %c0_i32 = arith.constant 0 : i32
    %c0_i32_0 = arith.constant 0 : i32
    %c0_i32_1 = arith.constant 0 : i32
    return %arg0, %c0_i32, %c0_i32_0 : i32, i32, i32
  }
  func.func @transform_21(%arg0: i32) -> (i32, i32, i32) {
    %c0_i32 = arith.constant 0 : i32
    %c0_i32_0 = arith.constant 0 : i32
    %c0_i32_1 = arith.constant 0 : i32
    return %arg0, %c0_i32, %c0_i32_0 : i32, i32, i32
  }
  func.func @transform_22(%arg0: i32) -> (i32, i32) {
    %c0_i32 = arith.constant 0 : i32
    %c0_i32_0 = arith.constant 0 : i32
    %c0_i32_1 = arith.constant 0 : i32
    return %c0_i32, %c0_i32_0 : i32, i32
  }
  func.func @transform_23(%arg0: i32) -> (i32, i32) {
    %c0_i32 = arith.constant 0 : i32
    %c0_i32_0 = arith.constant 0 : i32
    %c0_i32_1 = arith.constant 0 : i32
    return %c0_i32, %c0_i32_0 : i32, i32
  }
}

</mosaic_0001>

<bundles_post_ra>
// kernel: tpu_custom_call.1
= control target key start
LH: loop header
LB: loop body
LE: loop exit
PB: predicated region body
PF: predicated region fallthrough
CT: control target
= control target key end

     0   :  { %s3937_s0 = inlined_call_operand.vmem [shape: f32[64,64], index: 0, kind: input, shape index: {}]   ;;  %s3938_s1 = inlined_call_operand.vmem [shape: f32[64,8], index: 1, kind: input, shape index: {}]   ;;  %s3939_s2 = inlined_call_operand.vmem [shape: f32[64,1], index: 2, kind: input, shape index: {}]   ;;  %s3940_s3 = inlined_call_operand.vmem [shape: f32[32,32], index: 3, kind: input, shape index: {}]   ;;  %s3941_s4 = inlined_call_operand.vmem [shape: f32[8,32], index: 4, kind: input, shape index: {}]   ;;  %s3942_s5 = inlined_call_operand.vmem [shape: f32[2,8,16], index: 5, kind: input, shape index: {}]   ;;  %s3943_s6 = inlined_call_operand.vmem [shape: f32[2,1,16], index: 6, kind: input, shape index: {}]   ;;  %s3944_s7 = inlined_call_operand.vmem [shape: f32[2,16,32], index: 7, kind: input, shape index: {}]   ;;  %s3945_s8 = inlined_call_operand.vmem [shape: f32[2,1,32], index: 8, kind: input, shape index: {}]   ;;  %s3946_s9 = inlined_call_operand.vmem [shape: f32[2,1,32], index: 9, kind: input, shape index: {}]   ;;  %s3947_s10 = inlined_call_operand.vmem [shape: f32[2,1,32], index: 10, kind: input, shape index: {}]   ;;  %s3948_s11 = inlined_call_operand.vmem [shape: f32[2,1,32], index: 11, kind: input, shape index: {}]   ;;  %s3949_s12 = inlined_call_operand.vmem [shape: f32[2,1,32], index: 12, kind: input, shape index: {}]   ;;  %s3950_s13 = inlined_call_operand.vmem [shape: f32[2,1,32], index: 13, kind: input, shape index: {}]   ;;  %s3951_s14 = inlined_call_operand.vmem [shape: f32[2,1,32], index: 14, kind: input, shape index: {}]   ;;  %s3952_s15 = inlined_call_operand.vmem [shape: f32[2,1,32], index: 15, kind: input, shape index: {}]   ;;  %s3953_s16 = inlined_call_operand.vmem [shape: f32[2,1,32], index: 16, kind: input, shape index: {}]   ;;  %s3954_s17 = inlined_call_operand.vmem [shape: f32[2,96,32], index: 17, kind: input, shape index: {}]   ;;  %s3955_s18 = inlined_call_operand.vmem [shape: f32[2,1,32], index: 18, kind: input, shape index: {}]   ;;  %s3956_s19 = inlined_call_operand.vmem [shape: f32[2,64,32], index: 19, kind: input, shape index: {}]   ;;  %s3957_s20 = inlined_call_operand.vmem [shape: f32[2,64,16], index: 20, kind: input, shape index: {}]   ;;  %s3958_s21 = inlined_call_operand.vmem [shape: f32[2,64,32], index: 21, kind: output, shape index: {0}]   ;;  %s3959_s22 = inlined_call_operand.vmem [shape: f32[8,1], index: 22, kind: output, shape index: {1}]   ;;  %s3960_s23 = inlined_call_operand.hbm [shape: f32[8,32], index: 23, kind: output, shape index: {2}]  }
   0x1   :  { %3966 = sst [smem:[#allocation6_spill]] %s3937_s0 }
   0x2   :  { %3967 = sst [smem:[#allocation7_spill]] %s3938_s1 }
   0x3   :  { %3968 = sst [smem:[#allocation8_spill]] %s3939_s2 }
   0x4   :  { %3969 = sst [smem:[#allocation9_spill]] %s3940_s3 }
   0x5   :  { %3970 = sst [smem:[#allocation10_spill]] %s3941_s4 }
   0x6   :  { %3971 = sst [smem:[#allocation11_spill]] %s3942_s5 }
   0x7   :  { %3972 = sst [smem:[#allocation12_spill]] %s3943_s6 }
   0x8   :  { %3973 = sst [smem:[#allocation13_spill]] %s3944_s7 }
   0x9   :  { %3974 = sst [smem:[#allocation14_spill]] %s3957_s20 }
   0xa   :  { %29 = vsyncpa [#allocation4], 0  ;;  %s3311_s4 = smov 0  }
   0xb LB: > { %s3317_s30 = sadd.s32 4294967295, %s3185_s4   ;;  %p2754_p0 = scmp.ge.s32.totalorder %s3185_s4, 1  ;;  %s3185_s4 = sphi %s3311_s4, %s35_s4  }
   0xc   : > { %p760_p1 = scmp.lt.s32.totalorder %s3185_s4, 3 }
   0xe   : > { %p761_p2 = pnand %p2754_p0, %p760_p1 }
   0xf   : > { %p876_p3 = scmp.lt.s32.totalorder (!%p761_p2), %s3317_s30, 1  ;;  %s3975_s5 = sld [smem:[#allocation7_spill]] (!%p761_p2) }
  0x10   : > { %764 = sbr.rel (%p761_p2) target bundleno = 1561 (0x619), region = 104  ;;  %s3976_s27 = sld [smem:[#allocation11_spill]] (!%p761_p2) }
  0x11   : > { %s3977_s25 = sld [smem:[#allocation6_spill]] (!%p761_p2)  ;;  %p2826_p4 = scmp.ne.s32.totalorder (!%p761_p2), %s3317_s30, 0 }
  0x12   : > { %s3979_s6 = sld [smem:[#allocation12_spill]] (!%p761_p2) }
  0x13   : > { %s3980_s20 = sld [smem:[#allocation14_spill]] (!%p761_p2) }
  0x15   : > { %v938_v0 = vld [vmem:[%s3975_s5] sm:$0xff]  ;;  %vm947_vm0 = vcmask 64512   ;;  %s3327_s1 = scalar_select %p876_p3, %s3317_s30, 1  ;;  %v939_v2 = vld [vmem:[%s3975_s5 + $0x8] sm:$0xff]  ;;  %v940_v3 = vld [vmem:[%s3975_s5 + $0x10] sm:$0xff]  ;;  %vm1092_vm1 = vcmask 523264  }
  0x16   : > { %2933 = vmatprep.mubr.msk.f32.mxu0 %vm947_vm0, %v938_v0  ;;  %v941_v4 = vld [vmem:[%s3975_s5 + $0x18] sm:$0xff]  ;;  %v942_v5 = vld [vmem:[%s3975_s5 + $0x20] sm:$0xff]  ;;  %v943_v6 = vld [vmem:[%s3975_s5 + $0x28] sm:$0xff]  ;;  %vm1248_vm2 = vcmask 130048   ;;  %vm1492_vm3 = vcmask 261120  }
  0x17   : > { %s2755_s26 = sshll.u32 %s3327_s1, 3  ;;  %v944_v7 = vld [vmem:[%s3975_s5 + $0x30] sm:$0xff]  ;;  %v945_v8 = vld [vmem:[%s3975_s5 + $0x38] sm:$0xff]  ;;  %v1077_v9 = vld [vmem:[%s3977_s25] sm:$0xff]  ;;  %s3428_s28 = sshll.u32 %s3327_s1, 6 }
  0x18   : > { %s879_s7 = scalar_lea.vmem %s3976_s27, %s2755_s26  ;;  %2961 = vmatprep.mubr.msk.f32.mxu1 %vm1092_vm1, %v1077_v9  ;;  %s2835_s26 = sshll.u32 %s3327_s1, 4  ;;  %v3375_v19 = vld [vmem:[%s3977_s25 + $0x8] sm:$0xff]  ;;  %v3380_v20 = vld [vmem:[%s3977_s25 + $0x10] sm:$0xff]  ;;  %v3389_v21 = vld [vmem:[%s3977_s25 + $0x18] sm:$0xff] }
  0x19   : > { %v946_v1 = vld [vmem:[%s879_s7] sm:$0xff]  ;;  %s3978_s27 = sld [smem:[#allocation13_spill]]  ;;  %v3403_v23 = vld [vmem:[%s3977_s25 + $0x28] sm:$0xff]  ;;  %v3408_v24 = vld [vmem:[%s3977_s25 + $0x30] sm:$0xff]  ;;  %s3434_s0 = scalar_lea.vmem %s3980_s20, %s3428_s28 }
  0x1a   : > { %2931 = vmatprep.subr.mxu0 %v946_v1  ;;  %v3394_v22 = vld [vmem:[%s3977_s25 + $0x20] sm:$0xff]  ;;  %v3417_v25 = vld [vmem:[%s3977_s25 + $0x38] sm:$0xff]  ;;  %v1231_v35 = vld [vmem:[%s3434_s0 + $0x8] sm:$0xff]  ;;  %s3088_s3 = smul.u32 96, %s3327_s1  ;;  %s911_s2 = scalar_lea.vmem %s3952_s15, %s3327_s1 }
  0x1b   : > { %2932 = vmatpush3.msra.mxu0 %v946_v1  ;;  %v1230_v33 = vld [vmem:[%s3434_s0] sm:$0xff]  ;;  %v1232_v43 = vld [vmem:[%s3434_s0 + $0x10] sm:$0xff]  ;;  %v1233_v45 = vld [vmem:[%s3434_s0 + $0x18] sm:$0xff]  ;;  %s914_s29 = scalar_lea.vmem %s3953_s16, %s3327_s1  ;;  %s896_s5 = scalar_lea.vmem %s3947_s10, %s3327_s1 }
  0x1c   : > { %2934 = vmatmul.mubr.msk.f32.vlgmr.msra.gmra.mxu0 %vm947_vm0, %v939_v2  ;;  %v1234_v53 = vld [vmem:[%s3434_s0 + $0x20] sm:$0xff]  ;;  %v1235_v55 = vld [vmem:[%s3434_s0 + $0x28] sm:$0xff]  ;;  %v1236_v63 = vld [vmem:[%s3434_s0 + $0x30] sm:$0xff]  ;;  %s3480_s24 = scalar_lea.vmem %s3954_s17, %s3088_s3 }
  0x1d   : > { %2936 = vmatprep.mubr.msk.f32.mxu0 %vm947_vm0, %v940_v3  ;;  %v1237_v0 = vld [vmem:[%s3434_s0 + $0x38] sm:$0xff]  ;;  %s893_s0 = scalar_lea.vmem %s3946_s9, %s3327_s1 }
  0x1f   : > { %s3369_s7 = scalar_lea.vmem %s3978_s27, %s2835_s26  ;;  %s882_s27 = scalar_lea.vmem %s3979_s6, %s3327_s1 }
  0x20   : > { %2937 = vmatmul.mubr.msk.f32.gmra.mxu0 %vm947_vm0, %v941_v4  ;;  %v1247_v10 = vld [vmem:[%s3369_s7 + $0x8] sm:$0xff]  ;;  %v1246_v26 = vld [vmem:[%s3369_s7] sm:$0xff]  ;;  %v3187_v4 = vmov 0   ;;  %s3981_s26 = sld [smem:[#allocation8_spill]]  ;;  %s899_s7 = scalar_lea.vmem %s3948_s11, %s3327_s1 }
  0x21   : > { %2939 = vmatprep.mubr.msk.f32.mxu0 %vm947_vm0, %v942_v5  ;;  %2973 = vmatprep.subr.mxu0 %v1247_v10  ;;  %v2773_v27 = vld [vmem:[%s882_s27] ss:$0 sm:$0xff]  ;;  %s890_s27 = scalar_lea.vmem %s3945_s8, %s3327_s1  ;;  %s922_s6 = scalar_lea.vmem %s3955_s18, %s3327_s1 }
  0x22   : > { %2974 = vmatpush3.msra.mxu0 %v1247_v10  ;;  %3107 = vset.pattern.permute.xlu0 %v3187_v4 }
  0x23   : > { %2975 = vmatprep.subr.mxu0 %v1246_v26  ;;  %3108 = vset.pattern.permute.xlu1 %v3187_v4 }
  0x24   : > { %2940 = vmatmul.mubr.msk.f32.gmra.mxu0 %vm947_vm0, %v943_v6 }
  0x25   : > { %2942 = vmatprep.mubr.msk.f32.mxu0 %vm947_vm0, %v944_v7  ;;  %2976 = vmatpush3.msra.mxu0 %v1246_v26  ;;  %v3498_v26 = vld [vmem:[%s911_s2] ss:$0 sm:$0xff]  ;;  %s902_s2 = scalar_lea.vmem %s3949_s12, %s3327_s1 }
  0x26   : > { %v1589_v5 = vld [vmem:[%s3981_s26] sm:$0xff]  ;;  %v1591_v6 = vld [vmem:[%s3981_s26 + $0x10] sm:$0xff]  ;;  %v1590_v7 = vld [vmem:[%s3981_s26 + $0x8] sm:$0xff] }
  0x27   : > { %1600 = vperm.xlu0 %3107, %v1589_v5   ;;  %1610 = vperm.xlu1 %3108, %v1591_v6   ;;  %v1594_v10 = vld [vmem:[%s3981_s26 + $0x28] sm:$0xff] }
  0x28   : > { %2943 = vmatmul.mubr.msk.f32.gmra.mxu0 %vm947_vm0, %v945_v8  ;;  %v1592_v8 = vld [vmem:[%s3981_s26 + $0x18] sm:$0xff] }
  0x2b   : > { %1605 = vperm.xlu0 %3107, %v1590_v7   ;;  %1615 = vperm.xlu1 %3108, %v1592_v8  }
  0x2f   : > { %1625 = vperm.xlu1 %3108, %v1594_v10  }
  0xdc   : > { %v2935_v11 = vpop.f32.mrf.mxu0 }
  0xde   : > { %v1038_v12 = vpop.f32.mrf.mxu0 }
  0xe0   : > { %v2938_v13 = vpop.f32.mrf.mxu0 }
  0xe2   : > { %v1048_v14 = vpop.f32.mrf.mxu0 }
  0xe4   : > { %v2941_v15 = vpop.f32.mrf.mxu0 }
  0xe6   : > { %v1058_v16 = vpop.f32.mrf.mxu0 }
  0xe8   : > { %v2944_v17 = vpop.f32.mrf.mxu0 }
  0xe9   : > { %2945 = vmatprep.subr.mxu1 %v2944_v17 }
  0xea   : > { %v1068_v18 = vpop.f32.mrf.mxu0  ;;  %2946 = vmatpush3.msra.mxu1 %v2944_v17 }
  0xeb   : > { %2947 = vmatprep.subr.mxu1 %v1068_v18 }
  0xec   : > { %2948 = vmatpush3.msra.mxu1 %v1068_v18 }
  0xed   : > { %2949 = vmatprep.subr.mxu1 %v2941_v15 }
  0xee   : > { %2950 = vmatpush3.msra.mxu1 %v2941_v15  ;;  %v1876_v15 = vld [vmem:[%s3480_s24 + $0x28] sm:$0xff] }
  0xef   : > { %2951 = vmatprep.subr.mxu1 %v1058_v16 }
  0xf0   : > { %2952 = vmatpush3.msra.mxu1 %v1058_v16  ;;  %v1875_v16 = vld [vmem:[%s3480_s24 + $0x20] sm:$0xff] }
  0xf1   : > { %2953 = vmatprep.subr.mxu1 %v2938_v13 }
  0xf2   : > { %2954 = vmatpush3.msra.mxu1 %v2938_v13  ;;  %v1878_v13 = vld [vmem:[%s3480_s24 + $0x38] sm:$0xff] }
  0xf3   : > { %2955 = vmatprep.subr.mxu1 %v1048_v14  ;;  %3017 = vmatprep.subr.mxu0 %v1878_v13 }
  0xf4   : > { %2956 = vmatpush3.msra.mxu1 %v1048_v14  ;;  %v1877_v14 = vld [vmem:[%s3480_s24 + $0x30] sm:$0xff] }
  0xf5   : > { %2957 = vmatprep.subr.mxu1 %v2935_v11 }
  0xf6   : > { %2958 = vmatpush3.msra.mxu1 %v2935_v11  ;;  %v1595_v11 = vld [vmem:[%s3981_s26 + $0x30] sm:$0xff] }
  0xf7   : > { %2959 = vmatprep.subr.mxu1 %v1038_v12 }
  0xf8   : > { %2960 = vmatpush3.msra.mxu1 %v1038_v12  ;;  %v1596_v12 = vld [vmem:[%s3981_s26 + $0x38] sm:$0xff] }
  0xf9   : > { %2962 = vmatmul.mubr.msk.f32.vlgmr.msra.gmra.mxu1 %vm1092_vm1, %v3375_v19  ;;  %1635 = vperm.xlu1 %3108, %v1596_v12  }
  0xfa   : > { %2964 = vmatprep.mubr.msk.f32.mxu1 %vm1092_vm1, %v3380_v20 }
  0xfd   : > { %2965 = vmatmul.mubr.msk.f32.gmra.mxu1 %vm1092_vm1, %v3389_v21 }
  0xfe   : > { %2967 = vmatprep.mubr.msk.f32.mxu1 %vm1092_vm1, %v3394_v22 }
 0x101   : > { %2968 = vmatmul.mubr.msk.f32.gmra.mxu1 %vm1092_vm1, %v3403_v23 }
 0x102   : > { %2970 = vmatprep.mubr.msk.f32.mxu1 %vm1092_vm1, %v3408_v24 }
 0x105   : > { %2971 = vmatmul.mubr.msk.f32.gmra.mxu1 %vm1092_vm1, %v3417_v25 }
 0x106   : > { %3005 = vmatprep.mubr.msk.f32.mxu1 %vm1092_vm1, %v1077_v9  ;;  %v1593_v9 = vld [vmem:[%s3981_s26 + $0x20] sm:$0xff] }
 0x107   : > { %1620 = vperm.xlu0 %3107, %v1593_v9  }
 0x10b   : > { %1630 = vperm.xlu0 %3107, %v1595_v11  }
 0x1b9   : > { %v2963_v28 = vpop.f32.mrf.mxu1 }
 0x1ba   : > { %v1189_v29 = vadd.f32 %v2963_v28, %v2773_v27  ;;  %v1601_v28 = vpop.permute.xlu0 %1600 }
 0x1bb   : > { %v1183_v30 = vpop.f32.mrf.mxu1 }
 0x1bc   : > { %v1184_v31 = vadd.f32 %v2773_v27, %v1183_v30  ;;  %v1223_v32 = vmax.f32 %v1189_v29, 0.0  ;;  %v3500_v29 = vld [vmem:[%s914_s29] ss:$0 sm:$0xff]  ;;  %s3628_s29 = scalar_lea.vmem %s3956_s19, %s3428_s28 }
 0x1bd   : > { %v2966_v34 = vpop.f32.mrf.mxu1 }
 0x1be   : > { %v1222_v36 = vmax.f32 %v1184_v31, 0.0  ;;  %v1199_v37 = vadd.f32 %v2966_v34, %v2773_v27  ;;  %v1239_v41 = vmul.f32 %v1231_v35, %v1223_v32  ;;  %v1644_v31 = vmul.f32 %v3498_v26, %v1601_v28  ;;  %v1611_v34 = vpop.permute.xlu1 %1610  ;;  %v1606_v35 = vpop.permute.xlu0 %1605 }
 0x1bf   : > { %v1193_v38 = vpop.f32.mrf.mxu1 }
 0x1c0   : > { %v1238_v39 = vmul.f32 %v1230_v33, %v1222_v36  ;;  %v1194_v40 = vadd.f32 %v2773_v27, %v1193_v38  ;;  %v1225_v42 = vmax.f32 %v1199_v37, 0.0  ;;  %v3506_v33 = vadd.f32 %v3500_v29, %v1644_v31 }
 0x1c1   : > { %v2969_v44 = vpop.f32.mrf.mxu1  ;;  %v1646_v38 = vmul.f32 %v3498_v26, %v1611_v34 }
 0x1c2   : > { %v1224_v46 = vmax.f32 %v1194_v40, 0.0  ;;  %v1209_v47 = vadd.f32 %v2969_v44, %v2773_v27  ;;  %2977 = vmatprep.mubr.msk.f32.mxu0 %vm1248_vm2, %v1238_v39  ;;  %v1241_v51 = vmul.f32 %v1233_v45, %v1225_v42  ;;  %v1691_v37 = vmul.f32 %v3506_v33, %v3506_v33  ;;  %v1616_v45 = vpop.permute.xlu1 %1615 }
 0x1c3   : > { %v1203_v48 = vpop.f32.mrf.mxu1  ;;  %2978 = vmatmul.mubr.msk.f32.vlgmr.msra.gmra.mxu0 %vm1248_vm2, %v1239_v41  ;;  %v1645_v39 = vmul.f32 %v3498_v26, %v1606_v35  ;;  %v1669_v41 = vsel %vm1492_vm3, %v3506_v33, 0.0  ;;  %v3515_v42 = vadd.f32 %v3500_v29, %v1646_v38 }
 0x1c4   : > { %v1240_v49 = vmul.f32 %v1232_v43, %v1224_v46  ;;  %v1204_v50 = vadd.f32 %v2773_v27, %v1203_v48  ;;  %v1227_v52 = vmax.f32 %v1209_v47, 0.0  ;;  %3018 = vmatpush3.msra.mxu0 %v1878_v13  ;;  %v1699_v44 = vsel %vm1492_vm3, %v1691_v37, 0.0 }
 0x1c5   : > { %v2972_v54 = vpop.f32.mrf.mxu1  ;;  %3019 = vmatprep.subr.mxu0 %v1877_v14  ;;  %v3518_v43 = vadd.f32 %v3500_v29, %v1645_v39  ;;  %v1672_v47 = vsel %vm1492_vm3, %v3515_v42, 0.0  ;;  %v1693_v48 = vmul.f32 %v3515_v42, %v3515_v42 }
 0x1c6   : > { %v1226_v56 = vmax.f32 %v1204_v50, 0.0  ;;  %v1219_v57 = vadd.f32 %v2972_v54, %v2773_v27  ;;  %2980 = vmatprep.mubr.msk.f32.mxu0 %vm1248_vm2, %v1240_v49  ;;  %v1243_v61 = vmul.f32 %v1235_v55, %v1227_v52  ;;  %3020 = vmatpush3.msra.mxu0 %v1877_v14  ;;  %v1647_v52 = vmul.f32 %v3498_v26, %v1616_v45 }
 0x1c7   : > { %v1213_v58 = vpop.f32.mrf.mxu1  ;;  %2981 = vmatmul.mubr.msk.f32.gmra.mxu0 %vm1248_vm2, %v1241_v51  ;;  %3021 = vmatprep.subr.mxu0 %v1876_v15  ;;  %v1670_v49 = vsel %vm1492_vm3, %v3518_v43, 0.0  ;;  %v1692_v50 = vmul.f32 %v3518_v43, %v3518_v43  ;;  %v1702_v54 = vsel %vm1492_vm3, %v1693_v48, 0.0 }
 0x1c8   : > { %v1242_v59 = vmul.f32 %v1234_v53, %v1226_v56  ;;  %v1214_v60 = vadd.f32 %v2773_v27, %v1213_v58  ;;  %v1229_v62 = vmax.f32 %v1219_v57, 0.0  ;;  %3022 = vmatpush3.msra.mxu0 %v1876_v15  ;;  %v1671_v51 = vadd.f32 %v1670_v49, %v1669_v41  ;;  %v1621_v53 = vpop.permute.xlu0 %1620 }
 0x1c9   : > { %3023 = vmatprep.subr.mxu0 %v1875_v16  ;;  %v1700_v55 = vsel %vm1492_vm3, %v1692_v50, 0.0  ;;  %v1648_v56 = vmul.f32 %v3498_v26, %v1621_v53  ;;  %v3534_v58 = vadd.f32 %v3500_v29, %v1647_v52 }
 0x1ca   : > { %v1228_v1 = vmax.f32 %v1214_v60, 0.0  ;;  %2983 = vmatprep.mubr.msk.f32.mxu0 %vm1248_vm2, %v1242_v59  ;;  %v1245_v3 = vmul.f32 %v1237_v0, %v1229_v62  ;;  %3024 = vmatpush3.msra.mxu0 %v1875_v16  ;;  %v1701_v57 = vadd.f32 %v1700_v55, %v1699_v44  ;;  %v1673_v59 = vadd.f32 %v1672_v47, %v1671_v51  ;;  %v1626_v60 = vpop.permute.xlu1 %1625 }
 0x1cb   : > { %2984 = vmatmul.mubr.msk.f32.gmra.mxu0 %vm1248_vm2, %v1243_v61  ;;  %v3537_v61 = vadd.f32 %v3500_v29, %v1648_v56  ;;  %v1649_v62 = vmul.f32 %v3498_v26, %v1626_v60  ;;  %v1694_v0 = vmul.f32 %v3534_v58, %v3534_v58  ;;  %v1667_v56 = vld [vmem:[%s899_s7] sm:$0x1]  ;;  %s905_s7 = scalar_lea.vmem %s3950_s13, %s3327_s1 }
 0x1cc   : > { %v1244_v2 = vmul.f32 %v1236_v63, %v1228_v1  ;;  %v1674_v63 = vsel %vm1492_vm3, %v3534_v58, 0.0  ;;  %v1703_v1 = vadd.f32 %v1702_v54, %v1701_v57  ;;  %v1668_v60 = vld [vmem:[%s902_s2] sm:$0x1]  ;;  %s908_s2 = scalar_lea.vmem %s3951_s14, %s3327_s1 }
 0x1cd   : > { %v1676_v4 = vsel %vm1492_vm3, %v3537_v61, 0.0  ;;  %v1695_v5 = vmul.f32 %v3537_v61, %v3537_v61  ;;  %v3549_v6 = vadd.f32 %v3500_v29, %v1649_v62  ;;  %v1704_v7 = vsel %vm1492_vm3, %v1694_v0, 0.0 }
 0x1ce   : > { %2986 = vmatprep.mubr.msk.f32.mxu0 %vm1248_vm2, %v1244_v2  ;;  %v1631_v2 = vpop.permute.xlu0 %1630  ;;  %v1636_v9 = vpop.permute.xlu1 %1635  ;;  %v1705_v10 = vadd.f32 %v1704_v7, %v1703_v1 }
 0x1cf   : > { %2987 = vmatmul.mubr.msk.f32.gmra.mxu0 %vm1248_vm2, %v1245_v3  ;;  %v1675_v3 = vadd.f32 %v1674_v63, %v1673_v59  ;;  %v1650_v8 = vmul.f32 %v3498_v26, %v1631_v2  ;;  %v1706_v12 = vsel %vm1492_vm3, %v1695_v5, 0.0  ;;  %v1678_v13 = vsel %vm1492_vm3, %v3549_v6, 0.0 }
 0x1d0   : > { %v1696_v14 = vmul.f32 %v3549_v6, %v3549_v6  ;;  %v1651_v16 = vmul.f32 %v3498_v26, %v1636_v9 }
 0x1d1   : > { %v1677_v11 = vadd.f32 %v1676_v4, %v1675_v3  ;;  %v3560_v15 = vadd.f32 %v3500_v29, %v1650_v8 }
 0x1d2   : > { %v1708_v31 = vsel %vm1492_vm3, %v1696_v14, 0.0  ;;  %v3571_v35 = vadd.f32 %v3500_v29, %v1651_v16 }
 0x1d3   : > { %v1679_v28 = vadd.f32 %v1678_v13, %v1677_v11  ;;  %v1697_v34 = vmul.f32 %v3560_v15, %v3560_v15 }
 0x1d4   : > { %v1682_v37 = vsel %vm1492_vm3, %v3571_v35, 0.0  ;;  %v1698_v38 = vmul.f32 %v3571_v35, %v3571_v35 }
 0x283   : > { %v3486_v17 = vpop.f32.mrf.mxu0 }
 0x285   : > { %v3492_v18 = vpop.f32.mrf.mxu0 }
 0x287   : > { %v2982_v27 = vpop.f32.mrf.mxu0 }
 0x289   : > { %v3502_v30 = vpop.f32.mrf.mxu0 }
 0x28b   : > { %v2985_v32 = vpop.f32.mrf.mxu0 }
 0x28d   : > { %v1359_v36 = vpop.f32.mrf.mxu0 }
 0x28f   : > { %v2988_v40 = vpop.f32.mrf.mxu0 }
 0x290   : > { %2989 = vmatprep.subr.mxu1 %v2988_v40 }
 0x291   : > { %v1369_v46 = vpop.f32.mrf.mxu0  ;;  %2990 = vmatpush3.msra.mxu1 %v2988_v40 }
 0x292   : > { %2991 = vmatprep.subr.mxu1 %v1369_v46 }
 0x293   : > { %2992 = vmatpush3.msra.mxu1 %v1369_v46 }
 0x294   : > { %2993 = vmatprep.subr.mxu1 %v2985_v32 }
 0x295   : > { %2994 = vmatpush3.msra.mxu1 %v2985_v32  ;;  %v1680_v32 = vsel %vm1492_vm3, %v3560_v15, 0.0 }
 0x296   : > { %2995 = vmatprep.subr.mxu1 %v1359_v36 }
 0x297   : > { %2996 = vmatpush3.msra.mxu1 %v1359_v36  ;;  %v1681_v36 = vadd.f32 %v1680_v32, %v1679_v28 }
 0x298   : > { %2997 = vmatprep.subr.mxu1 %v2982_v27 }
 0x299   : > { %2998 = vmatpush3.msra.mxu1 %v2982_v27  ;;  %v1707_v27 = vadd.f32 %v1706_v12, %v1705_v10  ;;  %v1683_v40 = vadd.f32 %v1682_v37, %v1681_v36 }
 0x29a   : > { %2999 = vmatprep.subr.mxu1 %v3502_v30 }
 0x29b   : > { %3000 = vmatpush3.msra.mxu1 %v3502_v30  ;;  %v1709_v26 = vadd.f32 %v1708_v31, %v1707_v27  ;;  %v1710_v30 = vsel %vm1492_vm3, %v1697_v34, 0.0  ;;  %v1684_v29 = vrot.slane %v1683_v40, 4  ;;  %v3631_v34 = vld [vmem:[%s3628_s29] sm:$0xff] }
 0x29c   : > { %3001 = vmatprep.subr.mxu1 %v3486_v17 }
 0x29d   : > { %3002 = vmatpush3.msra.mxu1 %v3486_v17  ;;  %v1711_v39 = vadd.f32 %v1710_v30, %v1709_v26  ;;  %v1712_v17 = vsel %vm1492_vm3, %v1698_v38, 0.0  ;;  %v1685_v44 = vadd.f32 %v1684_v29, %v1683_v40  ;;  %v1775_v26 = vsel %vm1492_vm3, %v3631_v34, 0.0  ;;  %v3645_v38 = vld [vmem:[%s3628_s29 + $0x10] sm:$0xff] }
 0x29e   : > { %3003 = vmatprep.subr.mxu1 %v3492_v18  ;;  %v1797_v30 = vmul.f32 %v3631_v34, %v3631_v34  ;;  %v1778_v40 = vsel %vm1492_vm3, %v3645_v38, 0.0 }
 0x29f   : > { %3004 = vmatpush3.msra.mxu1 %v3492_v18  ;;  %v1713_v41 = vadd.f32 %v1712_v17, %v1711_v39  ;;  %v1686_v18 = vrot.slane %v1685_v44, 2  ;;  %v1799_v17 = vmul.f32 %v3645_v38, %v3645_v38 }
 0x2a0   : > { %3006 = vmatmul.mubr.msk.f32.vlgmr.msra.gmra.mxu1 %vm1092_vm1, %v3375_v19  ;;  %v1805_v29 = vsel %vm1492_vm3, %v1797_v30, 0.0  ;;  %v1773_v30 = vld [vmem:[%s905_s7] sm:$0x1] }
 0x2a1   : > { %3008 = vmatprep.mubr.msk.f32.mxu1 %vm1092_vm1, %v3380_v20  ;;  %v1714_v45 = vrot.slane %v1713_v41, 4  ;;  %v1687_v47 = vadd.f32 %v1686_v18, %v1685_v44  ;;  %v3654_v44 = vld [vmem:[%s3628_s29 + $0x18] sm:$0xff] }
 0x2a3   : > { %v1715_v46 = vadd.f32 %v1714_v45, %v1713_v41  ;;  %v1688_v19 = vrot.slane %v1687_v47, 1 }
 0x2a4   : > { %3009 = vmatmul.mubr.msk.f32.gmra.mxu1 %vm1092_vm1, %v3389_v21 }
 0x2a5   : > { %3011 = vmatprep.mubr.msk.f32.mxu1 %vm1092_vm1, %v3394_v22  ;;  %v1716_v48 = vrot.slane %v1715_v46, 2  ;;  %v1689_v49 = vadd.f32 %v1688_v19, %v1687_v47  ;;  %v1800_v47 = vmul.f32 %v3654_v44, %v3654_v44  ;;  %v3662_v19 = vld [vmem:[%s3628_s29 + $0x20] sm:$0xff] }
 0x2a7   : > { %v1717_v20 = vadd.f32 %v1716_v48, %v1715_v46  ;;  %v1690_v21 = vmul.f32 0.015625, %v1689_v49  ;;  %v1780_v46 = vsel %vm1492_vm3, %v3654_v44, 0.0  ;;  %v1808_v48 = vsel %vm1492_vm3, %v1799_v17, 0.0  ;;  %v1874_v17 = vld [vmem:[%s3480_s24 + $0x18] sm:$0xff] }
 0x2a8   : > { %3012 = vmatmul.mubr.msk.f32.gmra.mxu1 %vm1092_vm1, %v3403_v23  ;;  %v1554_v23 = vlaneseq  ;;  %3037 = vmatprep.subr.mxu1 %v1874_v17 }
 0x2a9   : > { %3014 = vmatprep.mubr.msk.f32.mxu1 %vm1092_vm1, %v3408_v24  ;;  %v1718_v50 = vrot.slane %v1717_v20, 1  ;;  %v1721_v52 = vmul.f32 %v1690_v21, %v1690_v21  ;;  %3038 = vmatpush3.msra.mxu1 %v1874_v17 }
 0x2aa   : > { %v1555_v24 = vshrl.u32 %v1554_v23, 7 }
 0x2ab   : > { %v1719_v22 = vadd.f32 %v1718_v50, %v1717_v20  ;;  %v1782_v50 = vsel %vm1492_vm3, %v3662_v19, 0.0 }
 0x2ac   : > { %3015 = vmatmul.mubr.msk.f32.gmra.mxu1 %vm1092_vm1, %v3417_v25  ;;  %v3604_v25 = vsub.s32 0, %v1555_v24  ;;  %v3678_v24 = vld [vmem:[%s3628_s29 + $0x30] sm:$0xff] }
 0x2ad   : > { %v1720_v51 = vmul.f32 0.015625, %v1719_v22  ;;  %v1810_v22 = vsel %vm1492_vm3, %v1800_v47, 0.0 }
 0x2af   : > { %v1722_v53 = vsub.f32 %v1720_v51, %v1721_v52  ;;  %v3670_v51 = vld [vmem:[%s3628_s29 + $0x28] sm:$0xff] }
 0x2b1   : > { %v1723_v54 = vmax.f32 %v1722_v53, 0.0 }
 0x2b3   : > { %v1724_v55 = vadd.f32 1e-05, %v1723_v54  ;;  %v1784_v54 = vsel %vm1492_vm3, %v3670_v51, 0.0 }
 0x2b5   : > { %3109 = vrsqrt.f32 %v1724_v55  ;;  %v1802_v55 = vmul.f32 %v3670_v51, %v3670_v51 }
 0x2c2   : > { %v3110_v57 = vpop.eup %3109 }
 0x2c3   : > { %v1726_v59 = vmul.f32 %v3110_v57, %v1667_v56 }
 0x2c5   : > { %v1727_v62 = vmul.f32 %v1726_v59, %v1690_v21  ;;  %v1733_v63 = vrot.slane %v1726_v59, %v3604_v25  ;;  %v1801_v21 = vmul.f32 %v3662_v19, %v3662_v19  ;;  %v1786_v59 = vsel %vm1492_vm3, %v3678_v24, 0.0 }
 0x2c7   : > { %v1728_v0 = vsub.f32 %v1668_v60, %v1727_v62  ;;  %v1735_v1 = vmul.f32 %v1733_v63, %v3506_v33  ;;  %v1736_v2 = vmul.f32 %v1733_v63, %v3518_v43  ;;  %v1737_v3 = vmul.f32 %v1733_v63, %v3515_v42 }
 0x2c8   : > { %v1738_v4 = vmul.f32 %v1733_v63, %v3534_v58  ;;  %v1739_v7 = vmul.f32 %v1733_v63, %v3537_v61  ;;  %v1740_v12 = vmul.f32 %v1733_v63, %v3549_v6  ;;  %v1741_v13 = vmul.f32 %v1733_v63, %v3560_v15 }
 0x2c9   : > { %v1747_v5 = vrot.slane %v1728_v0, %v3604_v25  ;;  %v1742_v42 = vmul.f32 %v1733_v63, %v3571_v35  ;;  %v3634_v35 = vld [vmem:[%s3628_s29 + $0x8] sm:$0xff]  ;;  %v1812_v23 = vsel %vm1492_vm3, %v1801_v21, 0.0  ;;  %v1803_v60 = vmul.f32 %v3678_v24, %v3678_v24  ;;  %v3686_v63 = vld [vmem:[%s3628_s29 + $0x38] sm:$0xff]  ;;  %s3867_s29 = scalar_lea.vmem %s3958_s21, %s3428_s28 }
 0x2ca   : > { %v1776_v36 = vsel %vm1492_vm3, %v3634_v35, 0.0  ;;  %v1798_v37 = vmul.f32 %v3634_v35, %v3634_v35  ;;  %v1814_v62 = vsel %vm1492_vm3, %v1802_v55, 0.0 }
 0x2cb   : > { %v1749_v8 = vadd.f32 %v1747_v5, %v1735_v1  ;;  %v1750_v9 = vadd.f32 %v1747_v5, %v1736_v2  ;;  %v1751_v10 = vadd.f32 %v1747_v5, %v1737_v3  ;;  %v1752_v11 = vadd.f32 %v1747_v5, %v1738_v4 }
 0x2cc   : > { %v1753_v43 = vadd.f32 %v1747_v5, %v1739_v7  ;;  %v1754_v61 = vadd.f32 %v1747_v5, %v1740_v12  ;;  %v1755_v28 = vadd.f32 %v1747_v5, %v1741_v13  ;;  %v1756_v15 = vadd.f32 %v1747_v5, %v1742_v42 }
 0x2cd   : > { %v1757_v14 = vmax.f32 %v1749_v8, 0.0  ;;  %v1758_v33 = vmax.f32 %v1750_v9, 0.0  ;;  %v1759_v16 = vmax.f32 %v1751_v10, 0.0  ;;  %v1760_v58 = vmax.f32 %v1752_v11, 0.0 }
 0x2ce   : > { %v1761_v27 = vmax.f32 %v1753_v43, 0.0  ;;  %v1762_v6 = vmax.f32 %v1754_v61, 0.0  ;;  %v1763_v31 = vmax.f32 %v1755_v28, 0.0  ;;  %v1764_v32 = vmax.f32 %v1756_v15, 0.0 }
 0x2cf   : > { %3025 = vmatprep.mubr.msk.f32.mxu0 %vm1492_vm3, %v1757_v14  ;;  %v1777_v39 = vadd.f32 %v1776_v36, %v1775_v26  ;;  %v1806_v41 = vsel %vm1492_vm3, %v1798_v37, 0.0  ;;  %v1788_v2 = vsel %vm1492_vm3, %v3686_v63, 0.0  ;;  %v1804_v3 = vmul.f32 %v3686_v63, %v3686_v63 }
 0x2d0   : > { %3026 = vmatmul.mubr.msk.f32.vlgmr.msra.gmra.mxu0 %vm1492_vm3, %v1758_v33  ;;  %v1807_v18 = vadd.f32 %v1806_v41, %v1805_v29  ;;  %v1816_v4 = vsel %vm1492_vm3, %v1803_v60, 0.0  ;;  %v1882_v29 = vld [vmem:[%s3480_s24 + $0x58] sm:$0xff] }
 0x2d1   : > { %3028 = vmatprep.mubr.msk.f32.mxu0 %vm1492_vm3, %v1759_v16  ;;  %v1779_v45 = vadd.f32 %v1778_v40, %v1777_v39  ;;  %v1818_v8 = vsel %vm1492_vm3, %v1804_v3, 0.0  ;;  %v1774_v40 = vld [vmem:[%s908_s2] sm:$0x1]  ;;  %3057 = vmatprep.subr.mxu0 %v1882_v29 }
 0x2d2   : > { %v1809_v49 = vadd.f32 %v1808_v48, %v1807_v18  ;;  %3058 = vmatpush3.msra.mxu0 %v1882_v29  ;;  %v1873_v18 = vld [vmem:[%s3480_s24 + $0x10] sm:$0xff] }
 0x2d3   : > { %v1781_v20 = vadd.f32 %v1780_v46, %v1779_v45  ;;  %v1881_v46 = vld [vmem:[%s3480_s24 + $0x50] sm:$0xff]  ;;  %3039 = vmatprep.subr.mxu1 %v1873_v18 }
 0x2d4   : > { %3029 = vmatmul.mubr.msk.f32.gmra.mxu0 %vm1492_vm3, %v1760_v58  ;;  %v1811_v53 = vadd.f32 %v1810_v22, %v1809_v49  ;;  %3059 = vmatprep.subr.mxu0 %v1881_v46  ;;  %v1880_v49 = vld [vmem:[%s3480_s24 + $0x48] sm:$0xff] }
 0x2d5   : > { %3031 = vmatprep.mubr.msk.f32.mxu0 %vm1492_vm3, %v1761_v27  ;;  %v1783_v52 = vadd.f32 %v1782_v50, %v1781_v20  ;;  %3040 = vmatpush3.msra.mxu1 %v1873_v18  ;;  %v1872_v20 = vld [vmem:[%s3480_s24 + $0x8] sm:$0xff]  ;;  %v1871_v50 = vld [vmem:[%s3480_s24] sm:$0xff] }
 0x2d6   : > { %v1813_v57 = vadd.f32 %v1812_v23, %v1811_v53  ;;  %3060 = vmatpush3.msra.mxu0 %v1881_v46  ;;  %3041 = vmatprep.subr.mxu1 %v1872_v20 }
 0x2d7   : > { %v1785_v56 = vadd.f32 %v1784_v54, %v1783_v52  ;;  %3061 = vmatprep.subr.mxu0 %v1880_v49  ;;  %v1879_v52 = vld [vmem:[%s3480_s24 + $0x40] sm:$0xff]  ;;  %3042 = vmatpush3.msra.mxu1 %v1872_v20 }
 0x2d8   : > { %3032 = vmatmul.mubr.msk.f32.gmra.mxu0 %vm1492_vm3, %v1762_v6  ;;  %v1815_v1 = vadd.f32 %v1814_v62, %v1813_v57  ;;  %3043 = vmatprep.subr.mxu1 %v1871_v50 }
 0x2d9   : > { %3034 = vmatprep.mubr.msk.f32.mxu0 %vm1492_vm3, %v1763_v31  ;;  %v1787_v0 = vadd.f32 %v1786_v59, %v1785_v56  ;;  %3062 = vmatpush3.msra.mxu0 %v1880_v49 }
 0x2da   : > { %v1817_v7 = vadd.f32 %v1816_v4, %v1815_v1  ;;  %3063 = vmatprep.subr.mxu0 %v1879_v52  ;;  %3044 = vmatpush3.msra.mxu1 %v1871_v50 }
 0x2db   : > { %v1789_v5 = vadd.f32 %v1788_v2, %v1787_v0  ;;  %3064 = vmatpush3.msra.mxu0 %v1879_v52 }
 0x2dc   : > { %3035 = vmatmul.mubr.msk.f32.gmra.mxu0 %vm1492_vm3, %v1764_v32  ;;  %v1819_v10 = vadd.f32 %v1818_v8, %v1817_v7  ;;  %v2790_v7 = vld [vmem:[%s890_s27] ss:$0 sm:$0xff] }
 0x2dd   : > { %v1790_v9 = vrot.slane %v1789_v5, 4 }
 0x2de   : > { %v1820_v12 = vrot.slane %v1819_v10, 4 }
 0x2df   : > { %v1791_v11 = vadd.f32 %v1790_v9, %v1789_v5 }
 0x2e0   : > { %v1821_v14 = vadd.f32 %v1820_v12, %v1819_v10 }
 0x2e1   : > { %v1792_v13 = vrot.slane %v1791_v11, 2 }
 0x2e2   : > { %v1822_v16 = vrot.slane %v1821_v14, 2 }
 0x2e3   : > { %v1793_v33 = vadd.f32 %v1792_v13, %v1791_v11 }
 0x2e4   : > { %v1823_v42 = vadd.f32 %v1822_v16, %v1821_v14 }
 0x2e5   : > { %v1794_v43 = vrot.slane %v1793_v33, 1 }
 0x2e6   : > { %v1824_v61 = vrot.slane %v1823_v42, 1 }
 0x2e7   : > { %v1795_v58 = vadd.f32 %v1794_v43, %v1793_v33 }
 0x2e8   : > { %v1825_v28 = vadd.f32 %v1824_v61, %v1823_v42 }
 0x2e9   : > { %v1796_v27 = vmul.f32 0.015625, %v1795_v58 }
 0x2ea   : > { %v1826_v6 = vmul.f32 0.015625, %v1825_v28 }
 0x2eb   : > { %v1827_v15 = vmul.f32 %v1796_v27, %v1796_v27 }
 0x2ed   : > { %v1828_v31 = vsub.f32 %v1826_v6, %v1827_v15 }
 0x2ef   : > { %v1829_v32 = vmax.f32 %v1828_v31, 0.0 }
 0x2f1   : > { %v1830_v26 = vadd.f32 1e-05, %v1829_v32 }
 0x2f3   : > { %3111 = vrsqrt.f32 %v1830_v26 }
 0x300   : > { %v3112_v36 = vpop.eup %3111 }
 0x301   : > { %v1832_v37 = vmul.f32 %v3112_v36, %v1773_v30 }
 0x303   : > { %v1833_v39 = vmul.f32 %v1832_v37, %v1796_v27  ;;  %v1839_v45 = vrot.slane %v1832_v37, %v3604_v25 }
 0x305   : > { %v1834_v41 = vsub.f32 %v1774_v40, %v1833_v39  ;;  %v1841_v47 = vmul.f32 %v1839_v45, %v3631_v34  ;;  %v1842_v22 = vmul.f32 %v1839_v45, %v3634_v35  ;;  %v1843_v55 = vmul.f32 %v1839_v45, %v3645_v38 }
 0x306   : > { %v1844_v35 = vmul.f32 %v1839_v45, %v3654_v44  ;;  %v1845_v59 = vmul.f32 %v1839_v45, %v3662_v19  ;;  %v1846_v62 = vmul.f32 %v1839_v45, %v3670_v51  ;;  %v1847_v3 = vmul.f32 %v1839_v45, %v3678_v24 }
 0x307   : > { %v1853_v48 = vrot.slane %v1834_v41, %v3604_v25  ;;  %v1848_v44 = vmul.f32 %v1839_v45, %v3686_v63 }
 0x309   : > { %v1855_v21 = vadd.f32 %v1853_v48, %v1841_v47  ;;  %v1856_v54 = vadd.f32 %v1853_v48, %v1842_v22  ;;  %v1857_v23 = vadd.f32 %v1853_v48, %v1843_v55  ;;  %v1858_v56 = vadd.f32 %v1853_v48, %v1844_v35 }
 0x30a   : > { %v1859_v0 = vadd.f32 %v1853_v48, %v1845_v59  ;;  %v1860_v1 = vadd.f32 %v1853_v48, %v1846_v62  ;;  %v1861_v19 = vadd.f32 %v1853_v48, %v1847_v3  ;;  %v1862_v4 = vadd.f32 %v1853_v48, %v1848_v44 }
 0x30b   : > { %v1863_v53 = vmax.f32 %v1855_v21, 0.0  ;;  %v1864_v34 = vmax.f32 %v1856_v54, 0.0  ;;  %v1865_v57 = vmax.f32 %v1857_v23, 0.0  ;;  %v1866_v60 = vmax.f32 %v1858_v56, 0.0 }
 0x30c   : > { %v1867_v38 = vmax.f32 %v1859_v0, 0.0  ;;  %v1868_v2 = vmax.f32 %v1860_v1, 0.0  ;;  %v1869_v51 = vmax.f32 %v1861_v19, 0.0  ;;  %v1870_v5 = vmax.f32 %v1862_v4, 0.0 }
 0x30d   : > { %3065 = vmatprep.mubr.msk.f32.mxu0 %vm1492_vm3, %v1863_v53 }
 0x30e   : > { %3066 = vmatmul.mubr.msk.f32.vlgmr.msra.gmra.mxu0 %vm1492_vm3, %v1864_v34 }
 0x30f   : > { %3068 = vmatprep.mubr.msk.f32.mxu0 %vm1492_vm3, %v1865_v57 }
 0x312   : > { %3069 = vmatmul.mubr.msk.f32.gmra.mxu0 %vm1492_vm3, %v1866_v60 }
 0x313   : > { %3071 = vmatprep.mubr.msk.f32.mxu0 %vm1492_vm3, %v1867_v38 }
 0x316   : > { %3072 = vmatmul.mubr.msk.f32.gmra.mxu0 %vm1492_vm3, %v1868_v2 }
 0x317   : > { %3074 = vmatprep.mubr.msk.f32.mxu0 %vm1492_vm3, %v1869_v51 }
 0x31a   : > { %3075 = vmatmul.mubr.msk.f32.gmra.mxu0 %vm1492_vm3, %v1870_v5 }
 0x360   : > { %v3007_v24 = vpop.f32.mrf.mxu1 }
 0x361   : > { %v3732_v8 = vadd.f32 %v3007_v24, %v2790_v7 }
 0x362   : > { %v1451_v9 = vpop.f32.mrf.mxu1 }
 0x363   : > { %v3734_v63 = vadd.f32 %v2790_v7, %v1451_v9  ;;  %v1516_v11 = vmul.f32 %v3732_v8, %v3732_v8  ;;  %v1494_v16 = vsel %vm1492_vm3, %v3732_v8, 0.0 }
 0x364   : > { %v3010_v10 = vpop.f32.mrf.mxu1 }
 0x365   : > { %v1493_v12 = vsel %vm1492_vm3, %v3734_v63, 0.0  ;;  %v1515_v13 = vmul.f32 %v3734_v63, %v3734_v63  ;;  %v3742_v14 = vadd.f32 %v3010_v10, %v2790_v7  ;;  %v1524_v28 = vsel %vm1492_vm3, %v1516_v11, 0.0 }
 0x366   : > { %v1461_v33 = vpop.f32.mrf.mxu1  ;;  %v1495_v58 = vadd.f32 %v1494_v16, %v1493_v12 }
 0x367   : > { %v1523_v43 = vsel %vm1492_vm3, %v1515_v13, 0.0  ;;  %v3747_v42 = vadd.f32 %v2790_v7, %v1461_v33  ;;  %v1518_v61 = vmul.f32 %v3742_v14, %v3742_v14  ;;  %v1498_v30 = vsel %vm1492_vm3, %v3742_v14, 0.0 }
 0x368   : > { %v3013_v27 = vpop.f32.mrf.mxu1  ;;  %v1525_v32 = vadd.f32 %v1524_v28, %v1523_v43  ;;  %v1491_v28 = vld [vmem:[%s896_s5] sm:$0x1] }
 0x369   : > { %v1496_v6 = vsel %vm1492_vm3, %v3747_v42, 0.0  ;;  %v1517_v15 = vmul.f32 %v3747_v42, %v3747_v42  ;;  %v3756_v31 = vadd.f32 %v3013_v27, %v2790_v7  ;;  %v1528_v40 = vsel %vm1492_vm3, %v1518_v61, 0.0 }
 0x36a   : > { %v1497_v26 = vadd.f32 %v1496_v6, %v1495_v58  ;;  %v1471_v36 = vpop.f32.mrf.mxu1  ;;  %v1490_v58 = vld [vmem:[%s893_s0] sm:$0x1] }
 0x36b   : > { %v1526_v37 = vsel %vm1492_vm3, %v1517_v15, 0.0  ;;  %v3761_v39 = vadd.f32 %v2790_v7, %v1471_v36  ;;  %v1520_v45 = vmul.f32 %v3756_v31, %v3756_v31  ;;  %v1502_v50 = vsel %vm1492_vm3, %v3756_v31, 0.0 }
 0x36c   : > { %v1527_v17 = vadd.f32 %v1526_v37, %v1525_v32  ;;  %v1499_v29 = vadd.f32 %v1498_v30, %v1497_v26  ;;  %v3016_v41 = vpop.f32.mrf.mxu1 }
 0x36d   : > { %v1500_v18 = vsel %vm1492_vm3, %v3761_v39, 0.0  ;;  %v1519_v46 = vmul.f32 %v3761_v39, %v3761_v39  ;;  %v3770_v47 = vadd.f32 %v3016_v41, %v2790_v7  ;;  %v1532_v54 = vsel %vm1492_vm3, %v1520_v45, 0.0 }
 0x36e   : > { %v1501_v48 = vadd.f32 %v1500_v18, %v1499_v29  ;;  %v1529_v20 = vadd.f32 %v1528_v40, %v1527_v17  ;;  %v1481_v49 = vpop.f32.mrf.mxu1 }
 0x36f   : > { %v1530_v21 = vsel %vm1492_vm3, %v1519_v46, 0.0  ;;  %v1482_v22 = vadd.f32 %v2790_v7, %v1481_v49  ;;  %v1522_v34 = vmul.f32 %v3770_v47, %v3770_v47  ;;  %v1506_v57 = vsel %vm1492_vm3, %v3770_v47, 0.0 }
 0x370   : > { %v1531_v52 = vadd.f32 %v1530_v21, %v1529_v20  ;;  %v1503_v53 = vadd.f32 %v1502_v50, %v1501_v48 }
 0x371   : > { %v1504_v55 = vsel %vm1492_vm3, %v1482_v22, 0.0  ;;  %v1521_v35 = vmul.f32 %v1482_v22, %v1482_v22  ;;  %v1536_v0 = vsel %vm1492_vm3, %v1522_v34, 0.0 }
 0x372   : > { %v1505_v23 = vadd.f32 %v1504_v55, %v1503_v53  ;;  %v1533_v56 = vadd.f32 %v1532_v54, %v1531_v52 }
 0x373   : > { %v1534_v59 = vsel %vm1492_vm3, %v1521_v35, 0.0 }
 0x374   : > { %v1507_v60 = vadd.f32 %v1506_v57, %v1505_v23  ;;  %v1535_v62 = vadd.f32 %v1534_v59, %v1533_v56 }
 0x376   : > { %v1508_v1 = vrot.slane %v1507_v60, 4  ;;  %v1537_v38 = vadd.f32 %v1536_v0, %v1535_v62 }
 0x378   : > { %v1509_v2 = vadd.f32 %v1508_v1, %v1507_v60  ;;  %v1538_v3 = vrot.slane %v1537_v38, 4 }
 0x37a   : > { %v1510_v44 = vrot.slane %v1509_v2, 2  ;;  %v1539_v19 = vadd.f32 %v1538_v3, %v1537_v38  ;;  %v2825_v38 = vld [vmem:[%s922_s6] ss:$0 sm:$0xff] }
 0x37c   : > { %v1511_v4 = vadd.f32 %v1510_v44, %v1509_v2  ;;  %v1540_v51 = vrot.slane %v1539_v19, 2 }
 0x37e   : > { %v1512_v5 = vrot.slane %v1511_v4, 1  ;;  %v1541_v7 = vadd.f32 %v1540_v51, %v1539_v19 }
 0x380   : > { %v1513_v24 = vadd.f32 %v1512_v5, %v1511_v4  ;;  %v1542_v9 = vrot.slane %v1541_v7, 1 }
 0x382   : > { %v1514_v10 = vmul.f32 0.015625, %v1513_v24  ;;  %v1543_v11 = vadd.f32 %v1542_v9, %v1541_v7 }
 0x384   : > { %v1544_v12 = vmul.f32 0.015625, %v1543_v11  ;;  %v1545_v13 = vmul.f32 %v1514_v10, %v1514_v10 }
 0x386   : > { %v1546_v33 = vsub.f32 %v1544_v12, %v1545_v13 }
 0x388   : > { %v1547_v16 = vmax.f32 %v1546_v33, 0.0 }
 0x38a   : > { %v1548_v43 = vadd.f32 1e-05, %v1547_v16 }
 0x38c   : > { %3113 = vrsqrt.f32 %v1548_v43 }
 0x399   : > { %v3114_v61 = vpop.eup %3113 }
 0x39a   : > { %v1550_v27 = vmul.f32 %v3114_v61, %v1490_v58 }
 0x39c   : > { %v1551_v6 = vmul.f32 %v1550_v27, %v1514_v10  ;;  %v1557_v15 = vrot.slane %v1550_v27, %v3604_v25 }
 0x39e   : > { %v1552_v32 = vsub.f32 %v1491_v28, %v1551_v6  ;;  %v1559_v36 = vmul.f32 %v1557_v15, %v3734_v63  ;;  %v1560_v30 = vmul.f32 %v1557_v15, %v3732_v8  ;;  %v1561_v37 = vmul.f32 %v1557_v15, %v3747_v42 }
 0x39f   : > { %v1562_v41 = vmul.f32 %v1557_v15, %v3742_v14  ;;  %v1563_v46 = vmul.f32 %v1557_v15, %v3761_v39  ;;  %v1564_v8 = vmul.f32 %v1557_v15, %v3756_v31  ;;  %v1565_v63 = vmul.f32 %v1557_v15, %v1482_v22  ;;  %v3027_v22 = vpop.f32.mrf.mxu0 }
 0x3a0   : > { %v1571_v26 = vrot.slane %v1552_v32, %v3604_v25  ;;  %v1566_v39 = vmul.f32 %v1557_v15, %v3770_v47 }
 0x3a1   : > { %v1973_v54 = vpop.f32.mrf.mxu0 }
 0x3a2   : > { %v1573_v40 = vadd.f32 %v1571_v26, %v1559_v36  ;;  %v1574_v17 = vadd.f32 %v1571_v26, %v1560_v30  ;;  %v1575_v29 = vadd.f32 %v1571_v26, %v1561_v37  ;;  %v1576_v48 = vadd.f32 %v1571_v26, %v1562_v41 }
 0x3a3   : > { %v1577_v25 = vadd.f32 %v1571_v26, %v1563_v46  ;;  %v1578_v49 = vadd.f32 %v1571_v26, %v1564_v8  ;;  %v1579_v50 = vadd.f32 %v1571_v26, %v1565_v63  ;;  %v1580_v52 = vadd.f32 %v1571_v26, %v1566_v39  ;;  %v3030_v34 = vpop.f32.mrf.mxu0 }
 0x3a4   : > { %v1581_v45 = vmax.f32 %v1573_v40, 0.0  ;;  %v1582_v18 = vmax.f32 %v1574_v17, 0.0  ;;  %v1583_v20 = vmax.f32 %v1575_v29, 0.0  ;;  %v1584_v42 = vmax.f32 %v1576_v48, 0.0 }
 0x3a5   : > { %v1585_v14 = vmax.f32 %v1577_v25, 0.0  ;;  %v1586_v21 = vmax.f32 %v1578_v49, 0.0  ;;  %v1587_v53 = vmax.f32 %v1579_v50, 0.0  ;;  %v1588_v31 = vmax.f32 %v1580_v52, 0.0  ;;  %v1983_v55 = vpop.f32.mrf.mxu0 }
 0x3a6   : > { %3045 = vmatprep.mubr.msk.f32.mxu1 %vm1492_vm3, %v1581_v45 }
 0x3a7   : > { %3046 = vmatmul.mubr.msk.f32.vlgmr.msra.gmra.mxu1 %vm1492_vm3, %v1582_v18  ;;  %v3033_v35 = vpop.f32.mrf.mxu0 }
 0x3a8   : > { %3048 = vmatprep.mubr.msk.f32.mxu1 %vm1492_vm3, %v1583_v20 }
 0x3a9   : > { %v1993_v23 = vpop.f32.mrf.mxu0 }
 0x3ab   : > { %3049 = vmatmul.mubr.msk.f32.gmra.mxu1 %vm1492_vm3, %v1584_v42  ;;  %v3036_v47 = vpop.f32.mrf.mxu0 }
 0x3ac   : > { %3051 = vmatprep.mubr.msk.f32.mxu1 %vm1492_vm3, %v1585_v14 }
 0x3ad   : > { %v2003_v56 = vpop.f32.mrf.mxu0 }
 0x3af   : > { %3052 = vmatmul.mubr.msk.f32.gmra.mxu1 %vm1492_vm3, %v1586_v21 }
 0x3b0   : > { %3054 = vmatprep.mubr.msk.f32.mxu1 %vm1492_vm3, %v1587_v53 }
 0x3b3   : > { %3055 = vmatmul.mubr.msk.f32.gmra.mxu1 %vm1492_vm3, %v1588_v31 }
 0x3ce   : > { %v3067_v57 = vpop.f32.mrf.mxu0 }
 0x3d0   : > { %v2231_v59 = vpop.f32.mrf.mxu0 }
 0x3d2   : > { %v3070_v60 = vpop.f32.mrf.mxu0 }
 0x3d4   : > { %v2241_v62 = vpop.f32.mrf.mxu0 }
 0x3d6   : > { %v3073_v3 = vpop.f32.mrf.mxu0 }
 0x3d8   : > { %v2251_v9 = vpop.f32.mrf.mxu0 }
 0x3da   : > { %v3076_v6 = vpop.f32.mrf.mxu0 }
 0x3dc   : > { %v2261_v41 = vpop.f32.mrf.mxu0 }
 0x467   : > { %v3047_v0 = vpop.f32.mrf.mxu1 }
 0x468   : > { %v2108_v1 = vadd.f32 %v3047_v0, %v3027_v22 }
 0x469   : > { %v2102_v2 = vpop.f32.mrf.mxu1 }
 0x46a   : > { %v2271_v44 = vadd.f32 %v3067_v57, %v2108_v1  ;;  %v2103_v19 = vadd.f32 %v2102_v2, %v1973_v54 }
 0x46b   : > { %v3050_v4 = vpop.f32.mrf.mxu1 }
 0x46c   : > { %v3812_v51 = vadd.f32 %v2825_v38, %v2271_v44  ;;  %v2270_v5 = vadd.f32 %v2231_v59, %v2103_v19  ;;  %v2118_v7 = vadd.f32 %v3050_v4, %v3030_v34 }
 0x46d   : > { %v2112_v24 = vpop.f32.mrf.mxu1 }
 0x46e   : > { %v3814_v10 = vadd.f32 %v2825_v38, %v2270_v5  ;;  %v2113_v11 = vadd.f32 %v2112_v24, %v1983_v55  ;;  %v2273_v12 = vadd.f32 %v3070_v60, %v2118_v7  ;;  %v2294_v13 = vmul.f32 %v3812_v51, %v3812_v51 }
 0x46f   : > { %v3053_v33 = vpop.f32.mrf.mxu1 }
 0x470   : > { %v3818_v16 = vadd.f32 %v2825_v38, %v2273_v12  ;;  %v2128_v43 = vadd.f32 %v3053_v33, %v3033_v35  ;;  %v2272_v58 = vadd.f32 %v2241_v62, %v2113_v11  ;;  %v2304_v61 = vsel %vm1492_vm3, %v2294_v13, 0.0 }
 0x471   : > { %2305 = vadd.xlane.f32.xlu1 %v2304_v61  ;;  %v2122_v27 = vpop.f32.mrf.mxu1  ;;  %v2293_v28 = vmul.f32 %v3814_v10, %v3814_v10 }
 0x472   : > { %v2123_v15 = vadd.f32 %v2122_v27, %v1993_v23  ;;  %v3823_v32 = vadd.f32 %v2825_v38, %v2272_v58  ;;  %v2275_v26 = vadd.f32 %v3073_v3, %v2128_v43  ;;  %v2296_v37 = vmul.f32 %v3818_v16, %v3818_v16 }
 0x473   : > { %v3056_v36 = vpop.f32.mrf.mxu1  ;;  %v2301_v30 = vsel %vm1492_vm3, %v2293_v28, 0.0 }
 0x474   : > { %v2138_v40 = vadd.f32 %v3056_v36, %v3036_v47  ;;  %v2274_v17 = vadd.f32 %v2251_v9, %v2123_v15  ;;  %2302 = vadd.xlane.f32.xlu0 %v2301_v30  ;;  %v3830_v46 = vadd.f32 %v2825_v38, %v2275_v26  ;;  %v2310_v20 = vsel %vm1492_vm3, %v2296_v37, 0.0 }
 0x475   : > { %v2132_v29 = vpop.f32.mrf.mxu1  ;;  %v2295_v25 = vmul.f32 %v3823_v32, %v3823_v32 }
 0x476   : > { %v3828_v45 = vadd.f32 %v2825_v38, %v2274_v17  ;;  %v2133_v18 = vadd.f32 %v2132_v29, %v2003_v56  ;;  %v2277_v48 = vadd.f32 %v3076_v6, %v2138_v40  ;;  %v2298_v39 = vmul.f32 %v3830_v46, %v3830_v46 }
 0x477   : > { %v2307_v14 = vsel %vm1492_vm3, %v2295_v25, 0.0 }
 0x478   : > { %v2276_v8 = vadd.f32 %v2261_v41, %v2133_v18  ;;  %2311 = vadd.xlane.f32.xlu0 %v2310_v20  ;;  %v2297_v63 = vmul.f32 %v3828_v45, %v3828_v45  ;;  %v3840_v50 = vadd.f32 %v2825_v38, %v2277_v48  ;;  %v2316_v53 = vsel %vm1492_vm3, %v2298_v39, 0.0 }
 0x47a   : > { %v3837_v42 = vadd.f32 %v2825_v38, %v2276_v8  ;;  %v2313_v49 = vsel %vm1492_vm3, %v2297_v63, 0.0  ;;  %v2300_v31 = vmul.f32 %v3840_v50, %v3840_v50 }
 0x47b   : > { %2314 = vadd.xlane.f32.xlu1 %v2313_v49 }
 0x47c   : > { %2308 = vadd.xlane.f32.xlu0 %v2307_v14  ;;  %v2299_v21 = vmul.f32 %v3837_v42, %v3837_v42  ;;  %v2322_v22 = vsel %vm1492_vm3, %v2300_v31, 0.0 }
 0x47e   : > { %v2319_v52 = vsel %vm1492_vm3, %v2299_v21, 0.0 }
 0x47f   : > { %2320 = vadd.xlane.f32.xlu1 %v2319_v52 }
 0x480   : > { %2317 = vadd.xlane.f32.xlu0 %v2316_v53 }
 0x484   : > { %2323 = vadd.xlane.f32.xlu0 %v2322_v22 }
 0x4fa   : > { %v2306_v54 = vpop.xlane.xlu1 %2305 }
 0x4fb   : > { %3115 = vrsqrt.f32 %v2306_v54  ;;  %vm2334_vm4 = vcmp.eq.f32.partialorder %v2306_v54, inf  ;;  %v2337_v60 = vand.u32 2147483648, %v2306_v54  ;;  %vm2336_vm5 = vcmp.eq.f32.partialorder %v2306_v54, 0.0 }
 0x4fd   : > { %v2303_v34 = vpop.xlane.xlu0 %2302 }
 0x4fe   : > { %3117 = vrsqrt.f32 %v2303_v34  ;;  %vm2327_vm6 = vcmp.eq.f32.partialorder %v2303_v34, inf  ;;  %v2330_v3 = vand.u32 2147483648, %v2303_v34  ;;  %vm2329_vm7 = vcmp.eq.f32.partialorder %v2303_v34, 0.0 }
 0x501   : > { %v2312_v55 = vpop.xlane.xlu0 %2311 }
 0x502   : > { %3119 = vrsqrt.f32 %v2312_v55  ;;  %vm2348_vm8 = vcmp.eq.f32.partialorder %v2312_v55, inf  ;;  %v2351_v9 = vand.u32 2147483648, %v2312_v55  ;;  %vm2350_vm9 = vcmp.eq.f32.partialorder %v2312_v55, 0.0 }
 0x504   : > { %v2315_v35 = vpop.xlane.xlu1 %2314 }
 0x505   : > { %3121 = vrsqrt.f32 %v2315_v35  ;;  %v2309_v23 = vpop.xlane.xlu0 %2308  ;;  %vm2355_vm10 = vcmp.eq.f32.partialorder %v2315_v35, inf  ;;  %v2358_v61 = vand.u32 2147483648, %v2315_v35  ;;  %vm2357_vm11 = vcmp.eq.f32.partialorder %v2315_v35, 0.0 }
 0x506   : > { %3123 = vrsqrt.f32 %v2309_v23  ;;  %vm2341_vm12 = vcmp.eq.f32.partialorder %v2309_v23, inf  ;;  %v2344_v6 = vand.u32 2147483648, %v2309_v23  ;;  %vm2343_vm13 = vcmp.eq.f32.partialorder %v2309_v23, 0.0 }
 0x508   : > { %v3116_v47 = vpop.eup %3115  ;;  %v2321_v56 = vpop.xlane.xlu1 %2320 }
 0x509   : > { %v2333_v57 = vmul.f32 %v3116_v47, %v2306_v54  ;;  %3125 = vrsqrt.f32 %v2321_v56  ;;  %v3852_v59 = vpop.xlane.xlu0 %2317  ;;  %vm2369_vm14 = vcmp.eq.f32.partialorder %v2321_v56, inf  ;;  %vm2371_vm15 = vcmp.eq.f32.partialorder %v2321_v56, 0.0 }
 0x50a   : > { %3127 = vrsqrt.f32 %v3852_v59  ;;  %v2372_v41 = vand.u32 2147483648, %v2321_v56  ;;  %vm2362_vm0 = vcmp.eq.f32.partialorder %v3852_v59, inf  ;;  %v2365_v20 = vand.u32 2147483648, %v3852_v59 }
 0x50b   : > { %v3118_v62 = vpop.eup %3117  ;;  %v2335_v0 = vsel %vm2334_vm4, %v2306_v54, %v2333_v57  ;;  %vm2364_vm1 = vcmp.eq.f32.partialorder %v3852_v59, 0.0 }
 0x50c   : > { %v2338_v1 = vsel %vm2336_vm5, %v2337_v60, %v2335_v0  ;;  %v2326_v38 = vmul.f32 %v3118_v62, %v2303_v34 }
 0x50d   : > { %v2382_v2 = vmax.f32 %v2338_v1, 1e-12  ;;  %v3855_v44 = vpop.xlane.xlu0 %2323 }
 0x50e   : > { %v2328_v19 = vsel %vm2327_vm6, %v2303_v34, %v2326_v38  ;;  %3129 = vrsqrt.f32 %v3855_v44  ;;  %vm2376_vm2 = vcmp.eq.f32.partialorder %v3855_v44, inf  ;;  %v2379_v31 = vand.u32 2147483648, %v3855_v44 }
 0x50f   : > { %v3120_v4 = vpop.eup %3119  ;;  %3131 = vrcp.f32 %v2382_v2  ;;  %v2331_v5 = vsel %vm2329_vm7, %v2330_v3, %v2328_v19  ;;  %vm2378_vm4 = vcmp.eq.f32.partialorder %v3855_v44, 0.0 }
 0x510   : > { %v2381_v7 = vmax.f32 %v2331_v5, 1e-12  ;;  %v2347_v24 = vmul.f32 %v3120_v4, %v2312_v55 }
 0x512   : > { %v3122_v11 = vpop.eup %3121  ;;  %3133 = vrcp.f32 %v2381_v7  ;;  %v2349_v12 = vsel %vm2348_vm8, %v2312_v55, %v2347_v24 }
 0x513   : > { %v3124_v13 = vpop.eup %3123  ;;  %v2352_v33 = vsel %vm2350_vm9, %v2351_v9, %v2349_v12  ;;  %v2354_v43 = vmul.f32 %v3122_v11, %v2315_v35 }
 0x514   : > { %v2384_v58 = vmax.f32 %v2352_v33, 1e-12  ;;  %v2340_v27 = vmul.f32 %v3124_v13, %v2309_v23 }
 0x515   : > { %v2356_v28 = vsel %vm2355_vm10, %v2315_v35, %v2354_v43 }
 0x516   : > { %v3126_v15 = vpop.eup %3125  ;;  %3135 = vrcp.f32 %v2384_v58  ;;  %v2359_v26 = vsel %vm2357_vm11, %v2358_v61, %v2356_v28  ;;  %v2342_v36 = vsel %vm2341_vm12, %v2309_v23, %v2340_v27 }
 0x517   : > { %v3128_v30 = vpop.eup %3127  ;;  %v2385_v37 = vmax.f32 %v2359_v26, 1e-12  ;;  %v2345_v40 = vsel %vm2343_vm13, %v2344_v6, %v2342_v36  ;;  %v2368_v17 = vmul.f32 %v3126_v15, %v2321_v56 }
 0x518   : > { %v2383_v29 = vmax.f32 %v2345_v40, 1e-12  ;;  %v2361_v18 = vmul.f32 %v3128_v30, %v3852_v59 }
 0x519   : > { %3137 = vrcp.f32 %v2385_v37  ;;  %v2370_v48 = vsel %vm2369_vm14, %v2321_v56, %v2368_v17 }
 0x51a   : > { %3139 = vrcp.f32 %v2383_v29  ;;  %v2373_v25 = vsel %vm2371_vm15, %v2372_v41, %v2370_v48  ;;  %v2363_v8 = vsel %vm2362_vm0, %v3852_v59, %v2361_v18 }
 0x51b   : > { %v3130_v63 = vpop.eup %3129  ;;  %v2387_v49 = vmax.f32 %v2373_v25, 1e-12  ;;  %v2366_v14 = vsel %vm2364_vm1, %v2365_v20, %v2363_v8 }
 0x51c   : > { %v3132_v39 = vpop.eup %3131  ;;  %v2386_v21 = vmax.f32 %v2366_v14, 1e-12  ;;  %v2375_v52 = vmul.f32 %v3130_v63, %v3855_v44 }
 0x51d   : > { %v2392_v53 = vmul.f32 %v3132_v39, %v3812_v51  ;;  %3141 = vrcp.f32 %v2387_v49 }
 0x51e   : > { %3143 = vrcp.f32 %v2386_v21  ;;  %v2377_v22 = vsel %vm2376_vm2, %v3855_v44, %v2375_v52 }
 0x51f   : > { %v3134_v54 = vpop.eup %3133  ;;  %2406 = vst.msk [vmem:[%s3867_s29 + $0x8] sm:$0xff] %vm1492_vm3, %v2392_v53  ;;  %v2380_v34 = vsel %vm2378_vm4, %v2379_v31, %v2377_v22 }
 0x520   : > { %v2390_v55 = vmul.f32 %v3134_v54, %v3814_v10  ;;  %v2388_v51 = vmax.f32 %v2380_v34, 1e-12 }
 0x522   : > { %2405 = vst.msk [vmem:[%s3867_s29] sm:$0xff] %vm1492_vm3, %v2390_v55  ;;  %3145 = vrcp.f32 %v2388_v51 }
 0x523   : > { %v3136_v35 = vpop.eup %3135 }
 0x524   : > { %v2396_v23 = vmul.f32 %v3136_v35, %v3818_v16 }
 0x526   : > { %v3138_v47 = vpop.eup %3137  ;;  %2408 = vst.msk [vmem:[%s3867_s29 + $0x18] sm:$0xff] %vm1492_vm3, %v2396_v23 }
 0x527   : > { %v3140_v56 = vpop.eup %3139  ;;  %v2398_v57 = vmul.f32 %v3138_v47, %v3828_v45 }
 0x528   : > { %v2394_v59 = vmul.f32 %v3140_v56, %v3823_v32 }
 0x529   : > { %2409 = vst.msk [vmem:[%s3867_s29 + $0x20] sm:$0xff] %vm1492_vm3, %v2398_v57 }
 0x52a   : > { %v3142_v10 = vpop.eup %3141  ;;  %2407 = vst.msk [vmem:[%s3867_s29 + $0x10] sm:$0xff] %vm1492_vm3, %v2394_v59 }
 0x52b   : > { %v3144_v60 = vpop.eup %3143  ;;  %v2402_v62 = vmul.f32 %v3142_v10, %v3837_v42 }
 0x52c   : > { %v2400_v0 = vmul.f32 %v3144_v60, %v3830_v46 }
 0x52d   : > { %2411 = vst.msk [vmem:[%s3867_s29 + $0x30] sm:$0xff] %vm1492_vm3, %v2402_v62 }
 0x52e   : > { %2410 = vst.msk [vmem:[%s3867_s29 + $0x28] sm:$0xff] %vm1492_vm3, %v2400_v0  ;;  %2416 = sbr.rel (%p2826_p4) target bundleno = 1332 (0x534), region = 108 }
 0x52f   : > { %v3146_v16 = vpop.eup %3145 }
 0x530   : > { %v2404_v1 = vmul.f32 %v3146_v16, %v3840_v50 }
 0x532   : > { %2412 = vst.msk [vmem:[%s3867_s29 + $0x38] sm:$0xff] %vm1492_vm3, %v2404_v1 }
 0x533   : > { %2417 = vst.msk [vmem:[#allocation2] sm:$0xff] %vm1492_vm3, %v2390_v55 }
 0x534 PF: > { %p2827_p5 = scmp.ne.s32.totalorder %s3317_s30, 1 }
 0x535   : > { %s3982_s0 = sld [smem:[#allocation9_spill]] (!%p2827_p5) }
 0x536   : > { %2421 = sbr.rel (%p2827_p5) target bundleno = 1546 (0x60a), region = 112  ;;  %s3983_s3 = sld [smem:[#allocation10_spill]] (!%p2827_p5) }
 0x53b   : > { %v2441_v32 = vld [vmem:[%s3982_s0 + $0x18] sm:$0xff]  ;;  %v3188_v45 = vmov 0.0   ;;  %v2440_v46 = vld [vmem:[%s3982_s0 + $0x10] sm:$0xff]  ;;  %vm3189_vm5 = vmmov 0   ;;  %v2422_v42 = vld [vmem:[#allocation2] sm:$0xff]  ;;  %vm2428_vm6 = vcmask 7168  }
 0x53c   : > { %3077 = vmatprep.subr.mxu0 %v3188_v45  ;;  %3085 = vmatprep.mubr.msk.f32.mxu0 %vm3189_vm5, %v3188_v45  ;;  %v2423_v50 = vmul.f32 %v2422_v42, %v2390_v55  ;;  %v2439_v38 = vld [vmem:[%s3982_s0 + $0x8] sm:$0xff]  ;;  %v2438_v3 = vld [vmem:[%s3982_s0] sm:$0xff] }
 0x53d   : > { %3078 = vmatpush3.msra.mxu0 %v2441_v32  ;;  %v2430_v4 = vld [vmem:[%s3983_s3] sm:$0xff] }
 0x53e   : > { %3079 = vmatprep.subr.mxu0 %v3188_v45  ;;  %v2424_v2 = vsel %vm1492_vm3, %v2423_v50, 0.0  ;;  %v2828_v5 = vadd.f32 -6.0, %v2430_v4 }
 0x53f   : > { %3080 = vmatpush3.msra.mxu0 %v2440_v46  ;;  %2425 = vadd.xlane.f32.xlu0 %v2424_v2 }
 0x540   : > { %3081 = vmatprep.subr.mxu0 %v3188_v45  ;;  %v2829_v7 = vmul.f32 -1.442695, %v2828_v5 }
 0x541   : > { %3082 = vmatpush3.msra.mxu0 %v2439_v38 }
 0x542   : > { %3083 = vmatprep.subr.mxu0 %v3188_v45  ;;  %3147 = vpow2.f32 %v2829_v7 }
 0x543   : > { %3084 = vmatpush3.msra.mxu0 %v2438_v3 }
 0x544   : > { %3086 = vmatmul.mubr.msk.f32.vlgmr.msra.gmra.mxu0 %vm1492_vm3, %v2422_v42 }
 0x54f   : > { %v3148_v24 = vpop.eup %3147 }
 0x550   : > { %v2435_v9 = vadd.f32 1.0, %v3148_v24 }
 0x552   : > { %3149 = vrcp.f32 %v2435_v9 }
 0x55f   : > { %v3150_v11 = vpop.eup %3149 }
 0x5c8   : > { %v2426_v44 = vpop.xlane.xlu0 %2425 }
 0x5c9   : > { %v2427_v19 = vmul.f32 100.0, %v2426_v44 }
 0x5cb   : > { %2429 = vst.msk [vmem:[%s3959_s22] sm:$0xff] %vm2428_vm6, %v2427_v19 }
 0x604   : > { %v2511_v12 = vpop.f32.mrf.mxu0 }
 0x605   : > { %v2515_v13 = vmul.f32 %v3150_v11, %v2511_v12 }
 0x606   : > { %v3087_v33 = vpop.f32.mrf.mxu0 }
 0x607   : > { %v2516_v43 = vmul.f32 100.0, %v2515_v13 }
 0x609   : > { %2517 = vst.msk [vmem:[#allocation3] sm:$0xff] %vm1492_vm3, %v2516_v43 }
 0x60a PF: > { %p3093_p6 = scmp.eq.s32.totalorder %s3317_s30, 1  ;;  %s3190_s7 = smov [#allocation3]  }
 0x60b   : > { %s2536_s20 = sshll.u32 %s3190_s7, 4  ;;  %s2537_s20 = int_to_ptr.vmem [resolvable:$true] %s2536_s20 }
 0x60c   : > { %s3151_s5 = scalar_lea.vmem %s2537_s20, 128  ;;  %p3158_p10 = scmp.lt.s32.totalorder %s2537_s20, %s2537_s20 }
 0x60d   : > { %p3152_p7 = scmp.ne.s32.totalorder %s2537_s20, %s3151_s5  ;;  %p3159_p11 = scmp.lt.s32.totalorder %s3151_s5, %s3151_s5 }
 0x60f   : > { %p3153_p8 = pnand %p3152_p7, %p3093_p6  ;;  %p3160_p12 = por %p3159_p11, %p3158_p10 }
 0x611   : > { %p3154_p9 = pneg %p3153_p8 }
 0x613   : > { %p3161_p13 = pnand %p3160_p12, %p3154_p9 }
 0x615   : > { %3164 = shalt.err (!%p3161_p13)
}
 0x616   : > { %3090 = dma.vmem_to_hbm [thread:$0]  (%p3093_p6), %s2537_s20, 128, %s3960_s23, [#allocation4]  }
 0x617   : > { %3180 = dma.done.wait (%p3093_p6), [#allocation4], 128  }
 0x618   : > { %3182 = vsyncadd (%p3093_p6), [#allocation4], 4294967168 }
 0x619 PF: > { %s35_s4 = sadd.s32 1, %s3185_s4  }
 0x61a   : > { %p32_p0 = scmp.ge.s32.totalorder %s35_s4, 4  }
 0x61c   :  { %34 = sbr.rel (!%p32_p0) target bundleno = 11 (0xb), region = 204 }
 0x621   :  { %2560 = vsyncpa [#allocation4], 1 }
 0x622   :  { %2562 = vsyncpa [#allocation4 + $0x1], 1 }

</bundles_post_ra>
